<compile_context>
chip_gen: v7x
topology: tpu7x:2x2x1
jax: 0.10.0
libtpu: 0.0.40
codegen_flags: <defaults>
</compile_context>

<pallas_src>
import functools

import jax
import jax.numpy as jnp
from jax import lax
from jax.experimental import pallas as pl
from jax.experimental.pallas import tpu as pltpu

BN_EPS = 1e-5
LANE = 128


def _round_up(x, m):
    return (x + m - 1) // m * m


def _pad2d(a, rows, cols):
    return jnp.pad(a, ((0, rows - a.shape[0]), (0, cols - a.shape[1])))


def _vmem_limit_bytes(*buffer_bytes):
    """Scoped-VMEM limit: double-buffer everything + headroom, clamped so the
    same plan fits v7x's 64 MiB/TC while still overriding v5e's 16 MiB default."""
    need = 2 * sum(int(b) for b in buffer_bytes) + (4 << 20)
    return int(min(max(need, 32 << 20), 60 << 20))


# ---------------------------------------------------------------------------
# Pallas kernels
# ---------------------------------------------------------------------------
def _make_conv3x3_stats_kernel(h, w, oc_pad):
    """Fused 3x3 'same' conv (no bias) + per-image channel sum / sum-of-squares.

    Reads one raw NHWC image (no im2col, no spatial zero ring in HBM), keeps
    the (9, C, OC_pad) weights resident in VMEM and loops over output rows.
    The three kw partial sums are accumulated with MXU dots; the +-1 column
    shifts ride the XLU (pltpu.roll) + VPU mask, off the MXU slot.
    """
    def kernel(x_ref, w_ref, conv_ref, stats_ref):
        # x_ref    : (H, W, C)       compute dtype
        # w_ref    : (9, C, OC_pad)  compute dtype, tap-major (kh * 3 + kw)
        # conv_ref : (H, W, OC_pad)  intermediate dtype (pre-BN conv output)
        # stats_ref: (2, OC_pad)     f32 per-image sum / sum-of-squares
        col = lax.broadcasted_iota(jnp.int32, (w, oc_pad), 0)  # output column id

        def row_body(i, carry):
            s0, s1 = carry
            accs = [jnp.zeros((w, oc_pad), jnp.float32) for _ in range(3)]
            for a in range(3):                                  # kh taps
                src = i + a - 1
                valid = jnp.logical_and(src >= 0, src <= h - 1)
                row = x_ref[jnp.clip(src, 0, h - 1)]            # (W, C)
                row = row * valid.astype(row.dtype)             # zero halo rows
                for b in range(3):                              # kw taps
                    accs[b] = accs[b] + jnp.dot(
                        row, w_ref[3 * a + b],
                        preferred_element_type=jnp.float32)
            # kw=0 feeds output columns 1..W-1, kw=2 feeds columns 0..W-2.
            left = jnp.where(col >= 1,
                             pltpu.roll(accs[0], shift=1, axis=0), 0.0)
            right = jnp.where(col <= w - 2,
                              pltpu.roll(accs[2], shift=w - 1, axis=0), 0.0)
            out_row = left + accs[1] + right                    # (W, OC_pad) f32
            conv_ref[i] = out_row.astype(conv_ref.dtype)
            s0 = s0 + jnp.sum(out_row, axis=0, keepdims=True)
            s1 = s1 + jnp.sum(out_row * out_row, axis=0, keepdims=True)
            return s0, s1

        s0, s1 = lax.fori_loop(
            0, h, row_body,
            (jnp.zeros((1, oc_pad), jnp.float32),
             jnp.zeros((1, oc_pad), jnp.float32)))
        stats_ref[0:1, :] = s0
        stats_ref[1:2, :] = s1

    return kernel


def _bn_relu_kernel(conv_ref, ss_ref, o_ref):
    """Fused BatchNorm (folded to a per-channel scale/shift) + ReLU."""
    scale = ss_ref[0:1, :][None]                                # (1, 1, OC_pad)
    shift = ss_ref[1:2, :][None]
    y = conv_ref[...].astype(jnp.float32) * scale + shift
    o_ref[...] = jnp.maximum(y, 0.0).astype(o_ref.dtype)


def _matmul_bias_kernel(x_ref, w_ref, b_ref, o_ref):
    """Single-shot (TM, K) @ (K, N) + bias with W/bias resident in VMEM."""
    o_ref[...] = (jnp.dot(x_ref[...], w_ref[...],
                          preferred_element_type=jnp.float32)
                  + b_ref[...])


# ---------------------------------------------------------------------------
# Pallas-backed ops
# ---------------------------------------------------------------------------
def _matmul_bias_pallas(x2d, w2d, bias1d, compute_dtype=jnp.bfloat16):
    m, k = x2d.shape
    nout = w2d.shape[1]
    k_pad = _round_up(k, LANE)
    n_pad = _round_up(nout, LANE)
    row_align = 16 if compute_dtype == jnp.bfloat16 else 8
    tm = 512 if m >= 512 else _round_up(m, row_align)
    m_pad = _round_up(m, tm)
    # TODO(synk): re-introduce an in-kernel K loop over the resident W block if
    # k_pad * (tm + n_pad) ever outgrows VMEM (not the case for 2x2 deconv here).

    itemsize = jnp.dtype(compute_dtype).itemsize
    x_p = _pad2d(x2d, m_pad, k_pad).astype(compute_dtype)
    w_p = _pad2d(w2d, k_pad, n_pad).astype(compute_dtype)
    b_p = jnp.pad(bias1d, (0, n_pad - nout)).reshape(1, n_pad).astype(jnp.float32)

    out = pl.pallas_call(
        _matmul_bias_kernel,
        out_shape=jax.ShapeDtypeStruct((m_pad, n_pad), jnp.float32),
        grid_spec=pltpu.PrefetchScalarGridSpec(
            num_scalar_prefetch=0,
            grid=(m_pad // tm,),
            in_specs=[
                pl.BlockSpec((tm, k_pad), lambda i: (i, 0)),
                pl.BlockSpec((k_pad, n_pad), lambda i: (0, 0)),   # resident W
                pl.BlockSpec((1, n_pad), lambda i: (0, 0)),       # resident bias
            ],
            out_specs=pl.BlockSpec((tm, n_pad), lambda i: (i, 0)),
        ),
        compiler_params=pltpu.CompilerParams(
            dimension_semantics=("parallel",),
            vmem_limit_bytes=_vmem_limit_bytes(
                tm * k_pad * itemsize, k_pad * n_pad * itemsize, tm * n_pad * 4)),
        cost_estimate=pl.CostEstimate(
            flops=2 * m_pad * k_pad * n_pad,
            transcendentals=0,
            bytes_accessed=(m_pad * k_pad * itemsize + k_pad * n_pad * itemsize
                            + 4 * m_pad * n_pad)),
    )(x_p, w_p, b_p)
    return out[:m, :nout]


def conv_transpose_2x2_s2_pallas(x_nchw, weight, bias, compute_dtype=jnp.bfloat16):
    """ConvTranspose2d(kernel=2, stride=2): non-overlapping taps, so it is exactly
    a per-pixel matmul (N*H*W, Cin) @ (Cin, OC*4) followed by a pixel shuffle.
    weight: (Cin, OC, 2, 2) (PyTorch layout), bias: (OC,). Returns NHWC f32."""
    n, cin, h, w = x_nchw.shape
    oc = weight.shape[1]
    xm = jnp.transpose(x_nchw, (0, 2, 3, 1)).reshape(n * h * w, cin)
    wm = weight.reshape(cin, oc * 4)            # columns ordered (oc, a, b)
    bm = jnp.repeat(bias, 4)                    # matches (oc, a, b) ordering

    y = _matmul_bias_pallas(xm, wm, bm, compute_dtype)          # (N*H*W, OC*4)
    y = y.reshape(n, h, w, oc, 2, 2)
    y = jnp.transpose(y, (0, 1, 4, 2, 5, 3)).reshape(n, 2 * h, 2 * w, oc)
    return y


def conv2d_block_pallas(x_nhwc, weight, gamma, beta, *, compute_dtype=jnp.bfloat16):
    """Conv2d(k=3, pad=1, bias folded into BN) -> BatchNorm2d (batch stats,
    training forward) -> ReLU, all in NHWC.

    x_nhwc may carry more channels than the weight's in-channels (lane padding
    from the previous block); those extra channels must be zero and the weight
    is zero-padded to match, so no channel slice/copy is needed between blocks.
    Returns (N, H, W, OC_pad) in compute_dtype with padded channels exactly 0.
    """
    n, h, w, c_in = x_nhwc.shape
    oc, c_w = weight.shape[0], weight.shape[1]
    assert c_w <= c_in
    oc_pad = _round_up(oc, LANE)

    # (OC, Cw, 3, 3) -> (3, 3, Cw, OC) -> zero-pad channels -> (9, C_in, OC_pad)
    w_t = jnp.transpose(weight, (2, 3, 1, 0))
    w_t = jnp.pad(w_t, ((0, 0), (0, 0), (0, c_in - c_w), (0, oc_pad - oc)))
    w_flat = w_t.reshape(9, c_in, oc_pad).astype(compute_dtype)
    x_c = x_nhwc.astype(compute_dtype)

    itemsize = jnp.dtype(compute_dtype).itemsize
    x_bytes = h * w * c_in * itemsize
    w_bytes = 9 * c_in * oc_pad * itemsize
    conv_bytes = h * w * oc_pad * itemsize

    # ---- pass 1: fused im2col + conv matmul + per-image channel stats --------
    # TODO(synk): for very large feature maps, tile spatially (row blocks with a
    # reshaped (R*W, C) LHS) to bound the per-step VMEM footprint and amortize
    # MXU weight pushes over more LHS rows.
    conv, stats = pl.pallas_call(
        _make_conv3x3_stats_kernel(h, w, oc_pad),
        out_shape=(jax.ShapeDtypeStruct((n, h, w, oc_pad), compute_dtype),
                   jax.ShapeDtypeStruct((n, 2, oc_pad), jnp.float32)),
        grid_spec=pltpu.PrefetchScalarGridSpec(
            num_scalar_prefetch=0,
            grid=(n,),                          # one image per step, batch-parallel
            in_specs=[
                pl.BlockSpec((None, h, w, c_in), lambda i: (i, 0, 0, 0)),
                # constant block index -> weights stay resident in VMEM
                pl.BlockSpec((9, c_in, oc_pad), lambda i: (0, 0, 0)),
            ],
            out_specs=[
                pl.BlockSpec((None, h, w, oc_pad), lambda i: (i, 0, 0, 0)),
                pl.BlockSpec((None, 2, oc_pad), lambda i: (i, 0, 0)),
            ],
        ),
        compiler_params=pltpu.CompilerParams(
            dimension_semantics=("parallel",),
            vmem_limit_bytes=_vmem_limit_bytes(x_bytes, w_bytes, conv_bytes)),
        cost_estimate=pl.CostEstimate(
            flops=2 * n * h * w * 9 * c_in * oc_pad,
            transcendentals=0,
            bytes_accessed=n * (x_bytes + conv_bytes) + w_bytes),
    )(x_c, w_flat)

    # ---- fold BatchNorm (batch stats over all N*H*W pixels, biased variance)
    #      into one per-channel scale/shift (tiny XLA reduction). ----
    m_total = n * h * w
    totals = jnp.sum(stats, axis=0)                     # (2, OC_pad) f32
    mean = totals[0] / m_total
    # E[x^2] - mean^2 with a clamp against fp cancellation.
    # TODO(synk): switch to per-image mean-shifted (compensated) sums if real
    # sizes push the cancellation error past tolerance.
    var = jnp.maximum(totals[1] / m_total - mean * mean, 0.0)
    inv = lax.rsqrt(var + BN_EPS)
    scale = jnp.pad(gamma, (0, oc_pad - oc)) * inv
    shift = jnp.pad(beta, (0, oc_pad - oc)) - mean * scale
    ss = jnp.stack([scale, shift], axis=0).astype(jnp.float32)   # (2, OC_pad)

    # ---- pass 2: fused scale/shift + ReLU, aliased in place over `conv` ------
    out = pl.pallas_call(
        _bn_relu_kernel,
        out_shape=jax.ShapeDtypeStruct((n, h, w, oc_pad), compute_dtype),
        grid_spec=pltpu.PrefetchScalarGridSpec(
            num_scalar_prefetch=0,
            grid=(n,),
            in_specs=[
                pl.BlockSpec((None, h, w, oc_pad), lambda i: (i, 0, 0, 0)),
                pl.BlockSpec((2, oc_pad), lambda i: (0, 0)),
            ],
            out_specs=pl.BlockSpec((None, h, w, oc_pad), lambda i: (i, 0, 0, 0)),
        ),
        compiler_params=pltpu.CompilerParams(
            dimension_semantics=("parallel",),
            vmem_limit_bytes=_vmem_limit_bytes(conv_bytes, conv_bytes)),
        cost_estimate=pl.CostEstimate(
            flops=2 * n * h * w * oc_pad,
            transcendentals=0,
            bytes_accessed=2 * n * conv_bytes),
        input_output_aliases={0: 0},       # normalize in place over the conv buffer
    )(conv, ss)
    return out


# ---------------------------------------------------------------------------
# XLA glue: bilinear (align_corners=True) resize used for ref_mask + sizematch
# ---------------------------------------------------------------------------
def bilinear_align_corners(x, out_h, out_w, axis_h=-2, axis_w=-1):
    # TODO(synk): gather-heavy bilinear resize has no clean Pallas mapping at
    # these sizes; left to XLA.
    axis_h %= x.ndim
    axis_w %= x.ndim
    in_h, in_w = x.shape[axis_h], x.shape[axis_w]

    def _lerp_idx(out_s, in_s):
        if out_s == 1 or in_s == 1:
            z = jnp.zeros((out_s,), jnp.int32)
            return z, z, jnp.zeros((out_s,), jnp.float32)
        pos = jnp.arange(out_s, dtype=jnp.float32) * ((in_s - 1) / (out_s - 1))
        lo = jnp.clip(jnp.floor(pos).astype(jnp.int32), 0, in_s - 2)
        return lo, lo + 1, pos - lo.astype(jnp.float32)

    def _bshape(axis, size):
        s = [1] * x.ndim
        s[axis] = size
        return s

    hlo, hhi, hf = _lerp_idx(out_h, in_h)
    wlo, whi, wf = _lerp_idx(out_w, in_w)
    xh = (jnp.take(x, hlo, axis=axis_h) * (1.0 - hf).reshape(_bshape(axis_h, out_h)) +
          jnp.take(x, hhi, axis=axis_h) * hf.reshape(_bshape(axis_h, out_h)))
    return (jnp.take(xh, wlo, axis=axis_w) * (1.0 - wf).reshape(_bshape(axis_w, out_w)) +
            jnp.take(xh, whi, axis=axis_w) * wf.reshape(_bshape(axis_w, out_w)))


# ---------------------------------------------------------------------------
# DecoderBlock forward (Pallas path)
# ---------------------------------------------------------------------------
def decoder_block_forward(params, x, x_copy, ref_feature, ref_mask,
                          *, compute_dtype=jnp.bfloat16):
    """x, x_copy, ref_feature are NCHW; ref_mask is (1, Hm, Wm). Returns NCHW f32."""
    hf, wf = ref_feature.shape[-2], ref_feature.shape[-1]

    mask = bilinear_align_corners(ref_mask[None].astype(jnp.float32), hf, wf)
    x_copy = ref_feature * mask + x_copy

    # Upsample with the stride-2 transposed conv (Pallas matmul+bias), NHWC out.
    x_up = conv_transpose_2x2_s2_pallas(x, params["up_w"], params["up_b"],
                                        compute_dtype=compute_dtype)
    x_up = bilinear_align_corners(x_up, hf, wf, axis_h=1, axis_w=2)

    # Channel concat in NHWC; single NCHW->NHWC transpose for the whole block.
    x_cat = jnp.concatenate([jnp.transpose(x_copy, (0, 2, 3, 1)), x_up],
                            axis=-1).astype(compute_dtype)

    # Conv biases (c1_cb/c2_cb) are intentionally unused: a per-channel constant
    # added before BatchNorm is cancelled exactly by the mean subtraction.
    y = conv2d_block_pallas(x_cat, params["c1_w"], params["c1_g"], params["c1_b"],
                            compute_dtype=compute_dtype)
    y = conv2d_block_pallas(y, params["c2_w"], params["c2_g"], params["c2_b"],
                            compute_dtype=compute_dtype)

    oc = params["c2_w"].shape[0]
    y = y[..., :oc].astype(jnp.float32)          # drop lane padding
    return jnp.transpose(y, (0, 3, 1, 2))        # back to NCHW


# ---------------------------------------------------------------------------
# Pure-JAX reference (for correctness check)
# ---------------------------------------------------------------------------
def _reference_conv_block(x, w, conv_b, gamma, beta):
    conv = jax.lax.conv_general_dilated(
        x, w, window_strides=(1, 1), padding=((1, 1), (1, 1)),
        dimension_numbers=("NCHW", "OIHW", "NCHW"))
    conv = conv + conv_b.reshape(1, -1, 1, 1)
    mean = jnp.mean(conv, axis=(0, 2, 3), keepdims=True)
    var = jnp.mean((conv - mean) ** 2, axis=(0, 2, 3), keepdims=True)
    y = (conv - mean) * jax.lax.rsqrt(var + BN_EPS)
    y = y * gamma.reshape(1, -1, 1, 1) + beta.reshape(1, -1, 1, 1)
    return jnp.maximum(y, 0.0)


def reference_decoder(params, x, x_copy, ref_feature, ref_mask):
    hf, wf = ref_feature.shape[-2], ref_feature.shape[-1]
    mask = bilinear_align_corners(ref_mask[None].astype(jnp.float32), hf, wf)
    x_copy = ref_feature * mask + x_copy

    # ConvTranspose2d(k=2, s=2): out[n,o,2i+a,2j+b] = sum_c x[n,c,i,j]*W[c,o,a,b] + b[o]
    wt, bt = params["up_w"], params["up_b"]
    y = jnp.einsum("nchw,coab->nohawb", x, wt)
    n_, o_, h_, _, w_, _ = y.shape
    x_up = y.reshape(n_, o_, 2 * h_, 2 * w_) + bt.reshape(1, -1, 1, 1)
    x_up = bilinear_align_corners(x_up, hf, wf)

    cat = jnp.concatenate([x_copy, x_up], axis=1)
    y = _reference_conv_block(cat, params["c1_w"], params["c1_cb"],
                              params["c1_g"], params["c1_b"])
    y = _reference_conv_block(y, params["c2_w"], params["c2_cb"],
                              params["c2_g"], params["c2_b"])
    return y


if __name__ == "__main__":
    INPUTS, OUTPUTS = 8, 4          # DecoderBlock(inputs=8, outputs=4)
    N, H, W = 2, 8, 8               # low-resolution decoder input
    HF, WF = 2 * H, 2 * W           # skip-connection resolution

    key = jax.random.PRNGKey(0)
    ks = jax.random.split(key, 14)

    x = jax.random.normal(ks[0], (N, INPUTS, H, W), jnp.float32)
    x_copy = jax.random.normal(ks[1], (N, INPUTS - OUTPUTS, HF, WF), jnp.float32)
    ref_feature = jax.random.normal(ks[2], (N, INPUTS - OUTPUTS, HF, WF), jnp.float32)
    ref_mask = jax.random.uniform(ks[3], (1, 2 * HF, 2 * WF), jnp.float32)

    params = {
        # ConvTranspose2d(inputs, outputs, kernel_size=2, stride=2)
        "up_w": 0.1 * jax.random.normal(ks[4], (INPUTS, OUTPUTS, 2, 2), jnp.float32),
        "up_b": 0.1 * jax.random.normal(ks[5], (OUTPUTS,), jnp.float32),
        # Conv2dBlock(inputs, outputs, 3, padding=1): conv weight/bias, BN gamma/beta
        "c1_w": 0.1 * jax.random.normal(ks[6], (OUTPUTS, INPUTS, 3, 3), jnp.float32),
        "c1_cb": 0.1 * jax.random.normal(ks[7], (OUTPUTS,), jnp.float32),
        "c1_g": 1.0 + 0.05 * jax.random.normal(ks[8], (OUTPUTS,), jnp.float32),
        "c1_b": 0.05 * jax.random.normal(ks[9], (OUTPUTS,), jnp.float32),
        # Conv2dBlock(outputs, outputs, 3, padding=1)
        "c2_w": 0.1 * jax.random.normal(ks[10], (OUTPUTS, OUTPUTS, 3, 3), jnp.float32),
        "c2_cb": 0.1 * jax.random.normal(ks[11], (OUTPUTS,), jnp.float32),
        "c2_g": 1.0 + 0.05 * jax.random.normal(ks[12], (OUTPUTS,), jnp.float32),
        "c2_b": 0.05 * jax.random.normal(ks[13], (OUTPUTS,), jnp.float32),
    }

    ref = reference_decoder(params, x, x_copy, ref_feature, ref_mask)

    # float32 path: tight check against the pure-XLA reference.
    fwd_f32 = jax.jit(functools.partial(decoder_block_forward,
                                        compute_dtype=jnp.float32))
    out = jax.block_until_ready(fwd_f32(params, x, x_copy, ref_feature, ref_mask))
    assert out.shape == (N, OUTPUTS, HF, WF), out.shape
    assert bool(jnp.all(jnp.isfinite(out)))
    assert jnp.allclose(out, ref, atol=1e-3, rtol=1e-3), \
        float(jnp.max(jnp.abs(out - ref)))

    # bfloat16 path (the production configuration from the perf review):
    # exercise compilation + a loose numerical sanity check.
    fwd_bf16 = jax.jit(functools.partial(decoder_block_forward,
                                         compute_dtype=jnp.bfloat16))
    out_bf = jax.block_until_ready(fwd_bf16(params, x, x_copy, ref_feature, ref_mask))
    assert out_bf.shape == ref.shape
    assert bool(jnp.all(jnp.isfinite(out_bf)))
    assert float(jnp.mean(jnp.abs(out_bf - ref))) < 0.2, \
        float(jnp.mean(jnp.abs(out_bf - ref)))

    print("KERNEL_OK")
</pallas_src>

<mosaic_0001>
module attributes {stable_mosaic.version = 11 : i64} {
  func.func @_matmul_bias_kernel(%arg0: i32, %arg1: memref<128x128xf32, #tpu.memory_space<vmem>>, %arg2: memref<128x128xf32, #tpu.memory_space<vmem>>, %arg3: memref<1x128xf32, #tpu.memory_space<vmem>>, %arg4: memref<128x128xf32, #tpu.memory_space<vmem>>) attributes {dimension_semantics = [#tpu.dimension_semantics<parallel>], iteration_bounds = array<i64: 1>, scalar_prefetch = 0 : i64, scratch_operands = 0 : i64, tpu.core_type = #tpu.core_type<tc>, window_params = [{transform_indices = @transform_0, window_bounds = array<i64: 128, 128>}, {pipeline_mode = #tpu.pipeline_mode<synchronous>, transform_indices = @transform_1, window_bounds = array<i64: 128, 128>}, {pipeline_mode = #tpu.pipeline_mode<synchronous>, transform_indices = @transform_2, window_bounds = array<i64: 1, 128>}, {transform_indices = @transform_3, window_bounds = array<i64: 128, 128>}]} {
    %c0 = arith.constant 0 : index
    %c0_0 = arith.constant 0 : index
    %0 = vector.load %arg1[%c0, %c0_0] : memref<128x128xf32, #tpu.memory_space<vmem>>, vector<128x128xf32>
    %c0_1 = arith.constant 0 : index
    %c0_2 = arith.constant 0 : index
    %1 = vector.load %arg2[%c0_1, %c0_2] : memref<128x128xf32, #tpu.memory_space<vmem>>, vector<128x128xf32>
    %cst = arith.constant dense<0.000000e+00> : vector<128x128xf32>
    %2 = tpu.matmul %0, %1, %cst {dimension_numbers = #tpu.dot_dimension_numbers<[1], [0], [0], [1], [0, 0, 1, 1], [], []>} : vector<128x128xf32>, vector<128x128xf32>, vector<128x128xf32> -> vector<128x128xf32>
    %c0_3 = arith.constant 0 : index
    %c0_4 = arith.constant 0 : index
    %3 = vector.load %arg3[%c0_3, %c0_4] : memref<1x128xf32, #tpu.memory_space<vmem>>, vector<1x128xf32>
    %4 = vector.broadcast %3 : vector<1x128xf32> to vector<128x128xf32>
    %5 = arith.addf %2, %4 : vector<128x128xf32>
    %c0_5 = arith.constant 0 : index
    %c0_6 = arith.constant 0 : index
    %6 = vector.load %arg4[%c0_5, %c0_6] : memref<128x128xf32, #tpu.memory_space<vmem>>, vector<128x128xf32>
    tpu.vector_store %arg4[%c0_5, %c0_6], %5 {strides = array<i32>} : memref<128x128xf32, #tpu.memory_space<vmem>>, vector<128x128xf32>,
    return
  }
  func.func @transform_0(%arg0: i32) -> (i32, i32) {
    %c0_i32 = arith.constant 0 : i32
    %c0_i32_0 = arith.constant 0 : i32
    return %arg0, %c0_i32 : i32, i32
  }
  func.func @transform_1(%arg0: i32) -> (i32, i32) {
    %c0_i32 = arith.constant 0 : i32
    %c0_i32_0 = arith.constant 0 : i32
    %c0_i32_1 = arith.constant 0 : i32
    return %c0_i32, %c0_i32_0 : i32, i32
  }
  func.func @transform_2(%arg0: i32) -> (i32, i32) {
    %c0_i32 = arith.constant 0 : i32
    %c0_i32_0 = arith.constant 0 : i32
    %c0_i32_1 = arith.constant 0 : i32
    return %c0_i32, %c0_i32_0 : i32, i32
  }
  func.func @transform_3(%arg0: i32) -> (i32, i32) {
    %c0_i32 = arith.constant 0 : i32
    %c0_i32_0 = arith.constant 0 : i32
    return %arg0, %c0_i32 : i32, i32
  }
}

module attributes {stable_mosaic.version = 11 : i64} {
  func.func @kernel(%arg0: i32, %arg1: memref<1x16x16x8xf32, #tpu.memory_space<vmem>>, %arg2: memref<9x8x128xf32, #tpu.memory_space<vmem>>, %arg3: memref<1x16x16x128xf32, #tpu.memory_space<vmem>>, %arg4: memref<1x2x128xf32, #tpu.memory_space<vmem>>) attributes {dimension_semantics = [#tpu.dimension_semantics<parallel>], iteration_bounds = array<i64: 2>, scalar_prefetch = 0 : i64, scratch_operands = 0 : i64, tpu.core_type = #tpu.core_type<tc>, window_params = [{transform_indices = @transform_0, window_bounds = array<i64: 1, 16, 16, 8>}, {pipeline_mode = #tpu.pipeline_mode<synchronous>, transform_indices = @transform_1, window_bounds = array<i64: 9, 8, 128>}, {transform_indices = @transform_2, window_bounds = array<i64: 1, 16, 16, 128>}, {transform_indices = @transform_3, window_bounds = array<i64: 1, 2, 128>}]} {
    %0 = tpu.iota {dimensions = array<i32: 0>} : vector<16x128xi32>
    %cst = arith.constant 0.000000e+00 : f32
    %1 = vector.broadcast %cst : f32 to vector<1x128xf32>
    %cst_0 = arith.constant 0.000000e+00 : f32
    %2 = vector.broadcast %cst_0 : f32 to vector<1x128xf32>
    %c0_i32 = arith.constant 0 : i32
    %c16_i32 = arith.constant 16 : i32
    %3 = arith.addi %c0_i32, %c16_i32 : i32
    %c1_i32 = arith.constant 1 : i32
    %4:2 = scf.for %arg5 = %c0_i32 to %3 step %c1_i32 iter_args(%arg6 = %1, %arg7 = %2) -> (vector<1x128xf32>, vector<1x128xf32>)  : i32 {
      %cst_6 = arith.constant 0.000000e+00 : f32
      %11 = vector.broadcast %cst_6 : f32 to vector<16x128xf32>
      %cst_7 = arith.constant 0.000000e+00 : f32
      %12 = vector.broadcast %cst_7 : f32 to vector<16x128xf32>
      %cst_8 = arith.constant 0.000000e+00 : f32
      %13 = vector.broadcast %cst_8 : f32 to vector<16x128xf32>
      %c0_i32_9 = arith.constant 0 : i32
      %14 = arith.addi %arg5, %c0_i32_9 : i32
      %c1_i32_10 = arith.constant 1 : i32
      %15 = arith.subi %14, %c1_i32_10 : i32
      %c0_i32_11 = arith.constant 0 : i32
      %16 = arith.cmpi sge, %15, %c0_i32_11 : i32
      %c15_i32 = arith.constant 15 : i32
      %17 = arith.cmpi sle, %15, %c15_i32 : i32
      %18 = arith.andi %16, %17 : i1
      %c0_i32_12 = arith.constant 0 : i32
      %c15_i32_13 = arith.constant 15 : i32
      %19 = arith.maxsi %c0_i32_12, %15 : i32
      %20 = arith.minsi %c15_i32_13, %19 : i32
      %c0_14 = arith.constant 0 : index
      %21 = arith.index_cast %20 : i32 to index
      %c0_15 = arith.constant 0 : index
      %c0_16 = arith.constant 0 : index
      %22 = vector.load %arg1[%c0_14, %21, %c0_15, %c0_16] : memref<1x16x16x8xf32, #tpu.memory_space<vmem>>, vector<1x1x16x8xf32>
      %23 = vector.shape_cast %22 : vector<1x1x16x8xf32> to vector<16x8xf32>
      %24 = arith.extui %18 : i1 to i32
      %25 = arith.sitofp %24 : i32 to f32
      %26 = vector.broadcast %25 : f32 to vector<16x8xf32>
      %27 = arith.mulf %23, %26 : vector<16x8xf32>
      %c0_17 = arith.constant 0 : index
      %c0_18 = arith.constant 0 : index
      %c0_19 = arith.constant 0 : index
      %28 = vector.load %arg2[%c0_17, %c0_18, %c0_19] : memref<9x8x128xf32, #tpu.memory_space<vmem>>, vector<1x8x128xf32>
      %29 = vector.shape_cast %28 : vector<1x8x128xf32> to vector<8x128xf32>
      %cst_20 = arith.constant dense<0.000000e+00> : vector<16x128xf32>
      %30 = tpu.matmul %27, %29, %cst_20 {dimension_numbers = #tpu.dot_dimension_numbers<[1], [0], [0], [1], [0, 0, 1, 1], [], []>} : vector<16x8xf32>, vector<8x128xf32>, vector<16x128xf32> -> vector<16x128xf32>
      %31 = arith.addf %11, %30 : vector<16x128xf32>
      %c1_21 = arith.constant 1 : index
      %c0_22 = arith.constant 0 : index
      %c0_23 = arith.constant 0 : index
      %32 = vector.load %arg2[%c1_21, %c0_22, %c0_23] : memref<9x8x128xf32, #tpu.memory_space<vmem>>, vector<1x8x128xf32>
      %33 = vector.shape_cast %32 : vector<1x8x128xf32> to vector<8x128xf32>
      %cst_24 = arith.constant dense<0.000000e+00> : vector<16x128xf32>
      %34 = tpu.matmul %27, %33, %cst_24 {dimension_numbers = #tpu.dot_dimension_numbers<[1], [0], [0], [1], [0, 0, 1, 1], [], []>} : vector<16x8xf32>, vector<8x128xf32>, vector<16x128xf32> -> vector<16x128xf32>
      %35 = arith.addf %12, %34 : vector<16x128xf32>
      %c2 = arith.constant 2 : index
      %c0_25 = arith.constant 0 : index
      %c0_26 = arith.constant 0 : index
      %36 = vector.load %arg2[%c2, %c0_25, %c0_26] : memref<9x8x128xf32, #tpu.memory_space<vmem>>, vector<1x8x128xf32>
      %37 = vector.shape_cast %36 : vector<1x8x128xf32> to vector<8x128xf32>
      %cst_27 = arith.constant dense<0.000000e+00> : vector<16x128xf32>
      %38 = tpu.matmul %27, %37, %cst_27 {dimension_numbers = #tpu.dot_dimension_numbers<[1], [0], [0], [1], [0, 0, 1, 1], [], []>} : vector<16x8xf32>, vector<8x128xf32>, vector<16x128xf32> -> vector<16x128xf32>
      %39 = arith.addf %13, %38 : vector<16x128xf32>
      %c1_i32_28 = arith.constant 1 : i32
      %40 = arith.addi %arg5, %c1_i32_28 : i32
      %c1_i32_29 = arith.constant 1 : i32
      %41 = arith.subi %40, %c1_i32_29 : i32
      %c0_i32_30 = arith.constant 0 : i32
      %42 = arith.cmpi sge, %41, %c0_i32_30 : i32
      %c15_i32_31 = arith.constant 15 : i32
      %43 = arith.cmpi sle, %41, %c15_i32_31 : i32
      %44 = arith.andi %42, %43 : i1
      %c0_i32_32 = arith.constant 0 : i32
      %c15_i32_33 = arith.constant 15 : i32
      %45 = arith.maxsi %c0_i32_32, %41 : i32
      %46 = arith.minsi %c15_i32_33, %45 : i32
      %c0_34 = arith.constant 0 : index
      %47 = arith.index_cast %46 : i32 to index
      %c0_35 = arith.constant 0 : index
      %c0_36 = arith.constant 0 : index
      %48 = vector.load %arg1[%c0_34, %47, %c0_35, %c0_36] : memref<1x16x16x8xf32, #tpu.memory_space<vmem>>, vector<1x1x16x8xf32>
      %49 = vector.shape_cast %48 : vector<1x1x16x8xf32> to vector<16x8xf32>
      %50 = arith.extui %44 : i1 to i32
      %51 = arith.sitofp %50 : i32 to f32
      %52 = vector.broadcast %51 : f32 to vector<16x8xf32>
      %53 = arith.mulf %49, %52 : vector<16x8xf32>
      %c3 = arith.constant 3 : index
      %c0_37 = arith.constant 0 : index
      %c0_38 = arith.constant 0 : index
      %54 = vector.load %arg2[%c3, %c0_37, %c0_38] : memref<9x8x128xf32, #tpu.memory_space<vmem>>, vector<1x8x128xf32>
      %55 = vector.shape_cast %54 : vector<1x8x128xf32> to vector<8x128xf32>
      %cst_39 = arith.constant dense<0.000000e+00> : vector<16x128xf32>
      %56 = tpu.matmul %53, %55, %cst_39 {dimension_numbers = #tpu.dot_dimension_numbers<[1], [0], [0], [1], [0, 0, 1, 1], [], []>} : vector<16x8xf32>, vector<8x128xf32>, vector<16x128xf32> -> vector<16x128xf32>
      %57 = arith.addf %31, %56 : vector<16x128xf32>
      %c4 = arith.constant 4 : index
      %c0_40 = arith.constant 0 : index
      %c0_41 = arith.constant 0 : index
      %58 = vector.load %arg2[%c4, %c0_40, %c0_41] : memref<9x8x128xf32, #tpu.memory_space<vmem>>, vector<1x8x128xf32>
      %59 = vector.shape_cast %58 : vector<1x8x128xf32> to vector<8x128xf32>
      %cst_42 = arith.constant dense<0.000000e+00> : vector<16x128xf32>
      %60 = tpu.matmul %53, %59, %cst_42 {dimension_numbers = #tpu.dot_dimension_numbers<[1], [0], [0], [1], [0, 0, 1, 1], [], []>} : vector<16x8xf32>, vector<8x128xf32>, vector<16x128xf32> -> vector<16x128xf32>
      %61 = arith.addf %35, %60 : vector<16x128xf32>
      %c5 = arith.constant 5 : index
      %c0_43 = arith.constant 0 : index
      %c0_44 = arith.constant 0 : index
      %62 = vector.load %arg2[%c5, %c0_43, %c0_44] : memref<9x8x128xf32, #tpu.memory_space<vmem>>, vector<1x8x128xf32>
      %63 = vector.shape_cast %62 : vector<1x8x128xf32> to vector<8x128xf32>
      %cst_45 = arith.constant dense<0.000000e+00> : vector<16x128xf32>
      %64 = tpu.matmul %53, %63, %cst_45 {dimension_numbers = #tpu.dot_dimension_numbers<[1], [0], [0], [1], [0, 0, 1, 1], [], []>} : vector<16x8xf32>, vector<8x128xf32>, vector<16x128xf32> -> vector<16x128xf32>
      %65 = arith.addf %39, %64 : vector<16x128xf32>
      %c2_i32 = arith.constant 2 : i32
      %66 = arith.addi %arg5, %c2_i32 : i32
      %c1_i32_46 = arith.constant 1 : i32
      %67 = arith.subi %66, %c1_i32_46 : i32
      %c0_i32_47 = arith.constant 0 : i32
      %68 = arith.cmpi sge, %67, %c0_i32_47 : i32
      %c15_i32_48 = arith.constant 15 : i32
      %69 = arith.cmpi sle, %67, %c15_i32_48 : i32
      %70 = arith.andi %68, %69 : i1
      %c0_i32_49 = arith.constant 0 : i32
      %c15_i32_50 = arith.constant 15 : i32
      %71 = arith.maxsi %c0_i32_49, %67 : i32
      %72 = arith.minsi %c15_i32_50, %71 : i32
      %c0_51 = arith.constant 0 : index
      %73 = arith.index_cast %72 : i32 to index
      %c0_52 = arith.constant 0 : index
      %c0_53 = arith.constant 0 : index
      %74 = vector.load %arg1[%c0_51, %73, %c0_52, %c0_53] : memref<1x16x16x8xf32, #tpu.memory_space<vmem>>, vector<1x1x16x8xf32>
      %75 = vector.shape_cast %74 : vector<1x1x16x8xf32> to vector<16x8xf32>
      %76 = arith.extui %70 : i1 to i32
      %77 = arith.sitofp %76 : i32 to f32
      %78 = vector.broadcast %77 : f32 to vector<16x8xf32>
      %79 = arith.mulf %75, %78 : vector<16x8xf32>
      %c6 = arith.constant 6 : index
      %c0_54 = arith.constant 0 : index
      %c0_55 = arith.constant 0 : index
      %80 = vector.load %arg2[%c6, %c0_54, %c0_55] : memref<9x8x128xf32, #tpu.memory_space<vmem>>, vector<1x8x128xf32>
      %81 = vector.shape_cast %80 : vector<1x8x128xf32> to vector<8x128xf32>
      %cst_56 = arith.constant dense<0.000000e+00> : vector<16x128xf32>
      %82 = tpu.matmul %79, %81, %cst_56 {dimension_numbers = #tpu.dot_dimension_numbers<[1], [0], [0], [1], [0, 0, 1, 1], [], []>} : vector<16x8xf32>, vector<8x128xf32>, vector<16x128xf32> -> vector<16x128xf32>
      %83 = arith.addf %57, %82 : vector<16x128xf32>
      %c7 = arith.constant 7 : index
      %c0_57 = arith.constant 0 : index
      %c0_58 = arith.constant 0 : index
      %84 = vector.load %arg2[%c7, %c0_57, %c0_58] : memref<9x8x128xf32, #tpu.memory_space<vmem>>, vector<1x8x128xf32>
      %85 = vector.shape_cast %84 : vector<1x8x128xf32> to vector<8x128xf32>
      %cst_59 = arith.constant dense<0.000000e+00> : vector<16x128xf32>
      %86 = tpu.matmul %79, %85, %cst_59 {dimension_numbers = #tpu.dot_dimension_numbers<[1], [0], [0], [1], [0, 0, 1, 1], [], []>} : vector<16x8xf32>, vector<8x128xf32>, vector<16x128xf32> -> vector<16x128xf32>
      %87 = arith.addf %61, %86 : vector<16x128xf32>
      %c8 = arith.constant 8 : index
      %c0_60 = arith.constant 0 : index
      %c0_61 = arith.constant 0 : index
      %88 = vector.load %arg2[%c8, %c0_60, %c0_61] : memref<9x8x128xf32, #tpu.memory_space<vmem>>, vector<1x8x128xf32>
      %89 = vector.shape_cast %88 : vector<1x8x128xf32> to vector<8x128xf32>
      %cst_62 = arith.constant dense<0.000000e+00> : vector<16x128xf32>
      %90 = tpu.matmul %79, %89, %cst_62 {dimension_numbers = #tpu.dot_dimension_numbers<[1], [0], [0], [1], [0, 0, 1, 1], [], []>} : vector<16x8xf32>, vector<8x128xf32>, vector<16x128xf32> -> vector<16x128xf32>
      %91 = arith.addf %65, %90 : vector<16x128xf32>
      %c1_i32_63 = arith.constant 1 : i32
      %92 = vector.broadcast %c1_i32_63 : i32 to vector<16x128xi32>
      %93 = arith.cmpi sge, %0, %92 : vector<16x128xi32>
      %c1_i32_64 = arith.constant 1 : i32
      %94 = tpu.dynamic_rotate %83 by %c1_i32_64 dim 0 : vector<16x128xf32>, i32 -> vector<16x128xf32>
      %cst_65 = arith.constant 0.000000e+00 : f32
      %95 = vector.broadcast %cst_65 : f32 to vector<16x128xf32>
      %96 = arith.select %93, %94, %95 : vector<16x128xi1>, vector<16x128xf32>
      %c14_i32 = arith.constant 14 : i32
      %97 = vector.broadcast %c14_i32 : i32 to vector<16x128xi32>
      %98 = arith.cmpi sle, %0, %97 : vector<16x128xi32>
      %c15_i32_66 = arith.constant 15 : i32
      %99 = tpu.dynamic_rotate %91 by %c15_i32_66 dim 0 : vector<16x128xf32>, i32 -> vector<16x128xf32>
      %cst_67 = arith.constant 0.000000e+00 : f32
      %100 = vector.broadcast %cst_67 : f32 to vector<16x128xf32>
      %101 = arith.select %98, %99, %100 : vector<16x128xi1>, vector<16x128xf32>
      %102 = arith.addf %96, %87 : vector<16x128xf32>
      %103 = arith.addf %102, %101 : vector<16x128xf32>
      %c0_68 = arith.constant 0 : index
      %104 = arith.index_cast %arg5 : i32 to index
      %c0_69 = arith.constant 0 : index
      %c0_70 = arith.constant 0 : index
      %105 = vector.load %arg3[%c0_68, %104, %c0_69, %c0_70] : memref<1x16x16x128xf32, #tpu.memory_space<vmem>>, vector<1x1x16x128xf32>
      %106 = vector.shape_cast %105 : vector<1x1x16x128xf32> to vector<16x128xf32>
      %107 = vector.shape_cast %103 : vector<16x128xf32> to vector<1x1x16x128xf32>
      tpu.vector_store %arg3[%c0_68, %104, %c0_69, %c0_70], %107 {strides = array<i32>} : memref<1x16x16x128xf32, #tpu.memory_space<vmem>>, vector<1x1x16x128xf32>,
      %cst_71 = arith.constant dense<0.000000e+00> : vector<128xf32>
      %108 = vector.multi_reduction <add>, %103, %cst_71 [0] : vector<16x128xf32> to vector<128xf32>
      %109 = vector.shape_cast %108 : vector<128xf32> to vector<1x128xf32>
      %110 = arith.addf %arg6, %109 : vector<1x128xf32>
      %111 = arith.mulf %103, %103 : vector<16x128xf32>
      %cst_72 = arith.constant dense<0.000000e+00> : vector<128xf32>
      %112 = vector.multi_reduction <add>, %111, %cst_72 [0] : vector<16x128xf32> to vector<128xf32>
      %113 = vector.shape_cast %112 : vector<128xf32> to vector<1x128xf32>
      %114 = arith.addf %arg7, %113 : vector<1x128xf32>
      scf.yield %110, %114 : vector<1x128xf32>, vector<1x128xf32>
    }
    %c16_i32_1 = arith.constant 16 : i32
    %c0 = arith.constant 0 : index
    %c0_2 = arith.constant 0 : index
    %c0_3 = arith.constant 0 : index
    %5 = vector.load %arg4[%c0, %c0_2, %c0_3] : memref<1x2x128xf32, #tpu.memory_space<vmem>>, vector<1x1x128xf32>
    %6 = vector.shape_cast %5 : vector<1x1x128xf32> to vector<1x128xf32>
    %7 = vector.shape_cast %4#0 : vector<1x128xf32> to vector<1x1x128xf32>
    tpu.vector_store %arg4[%c0, %c0_2, %c0_3], %7 {strides = array<i32>} : memref<1x2x128xf32, #tpu.memory_space<vmem>>, vector<1x1x128xf32>,
    %c0_4 = arith.constant 0 : index
    %c1 = arith.constant 1 : index
    %c0_5 = arith.constant 0 : index
    %8 = vector.load %arg4[%c0_4, %c1, %c0_5] : memref<1x2x128xf32, #tpu.memory_space<vmem>>, vector<1x1x128xf32>
    %9 = vector.shape_cast %8 : vector<1x1x128xf32> to vector<1x128xf32>
    %10 = vector.shape_cast %4#1 : vector<1x128xf32> to vector<1x1x128xf32>
    tpu.vector_store %arg4[%c0_4, %c1, %c0_5], %10 {strides = array<i32>} : memref<1x2x128xf32, #tpu.memory_space<vmem>>, vector<1x1x128xf32>,
    return
  }
  func.func @transform_0(%arg0: i32) -> (i32, i32, i32, i32) {
    %c0_i32 = arith.constant 0 : i32
    %c0_i32_0 = arith.constant 0 : i32
    %c0_i32_1 = arith.constant 0 : i32
    %c0_i32_2 = arith.constant 0 : i32
    return %arg0, %c0_i32, %c0_i32_0, %c0_i32_1 : i32, i32, i32, i32
  }
  func.func @transform_1(%arg0: i32) -> (i32, i32, i32) {
    %c0_i32 = arith.constant 0 : i32
    %c0_i32_0 = arith.constant 0 : i32
    %c0_i32_1 = arith.constant 0 : i32
    %c0_i32_2 = arith.constant 0 : i32
    return %c0_i32, %c0_i32_0, %c0_i32_1 : i32, i32, i32
  }
  func.func @transform_2(%arg0: i32) -> (i32, i32, i32, i32) {
    %c0_i32 = arith.constant 0 : i32
    %c0_i32_0 = arith.constant 0 : i32
    %c0_i32_1 = arith.constant 0 : i32
    %c0_i32_2 = arith.constant 0 : i32
    return %arg0, %c0_i32, %c0_i32_0, %c0_i32_1 : i32, i32, i32, i32
  }
  func.func @transform_3(%arg0: i32) -> (i32, i32, i32) {
    %c0_i32 = arith.constant 0 : i32
    %c0_i32_0 = arith.constant 0 : i32
    %c0_i32_1 = arith.constant 0 : i32
    return %arg0, %c0_i32, %c0_i32_0 : i32, i32, i32
  }
}

module attributes {stable_mosaic.version = 11 : i64} {
  func.func @_bn_relu_kernel(%arg0: i32, %arg1: memref<1x16x16x128xf32, #tpu.memory_space<vmem>>, %arg2: memref<2x128xf32, #tpu.memory_space<vmem>>, %arg3: memref<1x16x16x128xf32, #tpu.memory_space<vmem>>) attributes {dimension_semantics = [#tpu.dimension_semantics<parallel>], iteration_bounds = array<i64: 2>, scalar_prefetch = 0 : i64, scratch_operands = 0 : i64, tpu.core_type = #tpu.core_type<tc>, window_params = [{transform_indices = @transform_0, window_bounds = array<i64: 1, 16, 16, 128>}, {pipeline_mode = #tpu.pipeline_mode<synchronous>, transform_indices = @transform_1, window_bounds = array<i64: 2, 128>}, {transform_indices = @transform_2, window_bounds = array<i64: 1, 16, 16, 128>}]} {
    %c0 = arith.constant 0 : index
    %c0_0 = arith.constant 0 : index
    %0 = vector.load %arg2[%c0, %c0_0] : memref<2x128xf32, #tpu.memory_space<vmem>>, vector<1x128xf32>
    %1 = vector.shape_cast %0 : vector<1x128xf32> to vector<1x1x128xf32>
    %c1 = arith.constant 1 : index
    %c0_1 = arith.constant 0 : index
    %2 = vector.load %arg2[%c1, %c0_1] : memref<2x128xf32, #tpu.memory_space<vmem>>, vector<1x128xf32>
    %3 = vector.shape_cast %2 : vector<1x128xf32> to vector<1x1x128xf32>
    %c0_2 = arith.constant 0 : index
    %c0_3 = arith.constant 0 : index
    %c0_4 = arith.constant 0 : index
    %c0_5 = arith.constant 0 : index
    %4 = vector.load %arg1[%c0_2, %c0_3, %c0_4, %c0_5] : memref<1x16x16x128xf32, #tpu.memory_space<vmem>>, vector<1x16x16x128xf32>
    %5 = vector.shape_cast %4 : vector<1x16x16x128xf32> to vector<16x16x128xf32>
    %6 = vector.broadcast %1 : vector<1x1x128xf32> to vector<16x16x128xf32>
    %7 = arith.mulf %5, %6 : vector<16x16x128xf32>
    %8 = vector.broadcast %3 : vector<1x1x128xf32> to vector<16x16x128xf32>
    %9 = arith.addf %7, %8 : vector<16x16x128xf32>
    %cst = arith.constant 0.000000e+00 : f32
    %10 = vector.broadcast %cst : f32 to vector<16x16x128xf32>
    %11 = arith.maximumf %9, %10 : vector<16x16x128xf32>
    %c0_6 = arith.constant 0 : index
    %c0_7 = arith.constant 0 : index
    %c0_8 = arith.constant 0 : index
    %c0_9 = arith.constant 0 : index
    %12 = vector.load %arg3[%c0_6, %c0_7, %c0_8, %c0_9] : memref<1x16x16x128xf32, #tpu.memory_space<vmem>>, vector<1x16x16x128xf32>
    %13 = vector.shape_cast %12 : vector<1x16x16x128xf32> to vector<16x16x128xf32>
    %14 = vector.shape_cast %11 : vector<16x16x128xf32> to vector<1x16x16x128xf32>
    tpu.vector_store %arg3[%c0_6, %c0_7, %c0_8, %c0_9], %14 {strides = array<i32>} : memref<1x16x16x128xf32, #tpu.memory_space<vmem>>, vector<1x16x16x128xf32>,
    return
  }
  func.func @transform_0(%arg0: i32) -> (i32, i32, i32, i32) {
    %c0_i32 = arith.constant 0 : i32
    %c0_i32_0 = arith.constant 0 : i32
    %c0_i32_1 = arith.constant 0 : i32
    %c0_i32_2 = arith.constant 0 : i32
    return %arg0, %c0_i32, %c0_i32_0, %c0_i32_1 : i32, i32, i32, i32
  }
  func.func @transform_1(%arg0: i32) -> (i32, i32) {
    %c0_i32 = arith.constant 0 : i32
    %c0_i32_0 = arith.constant 0 : i32
    %c0_i32_1 = arith.constant 0 : i32
    return %c0_i32, %c0_i32_0 : i32, i32
  }
  func.func @transform_2(%arg0: i32) -> (i32, i32, i32, i32) {
    %c0_i32 = arith.constant 0 : i32
    %c0_i32_0 = arith.constant 0 : i32
    %c0_i32_1 = arith.constant 0 : i32
    %c0_i32_2 = arith.constant 0 : i32
    return %arg0, %c0_i32, %c0_i32_0, %c0_i32_1 : i32, i32, i32, i32
  }
}

module attributes {stable_mosaic.version = 11 : i64} {
  func.func @kernel(%arg0: i32, %arg1: memref<1x16x16x128xf32, #tpu.memory_space<vmem>>, %arg2: memref<9x128x128xf32, #tpu.memory_space<vmem>>, %arg3: memref<1x16x16x128xf32, #tpu.memory_space<vmem>>, %arg4: memref<1x2x128xf32, #tpu.memory_space<vmem>>) attributes {dimension_semantics = [#tpu.dimension_semantics<parallel>], iteration_bounds = array<i64: 2>, scalar_prefetch = 0 : i64, scratch_operands = 0 : i64, tpu.core_type = #tpu.core_type<tc>, window_params = [{transform_indices = @transform_0, window_bounds = array<i64: 1, 16, 16, 128>}, {pipeline_mode = #tpu.pipeline_mode<synchronous>, transform_indices = @transform_1, window_bounds = array<i64: 9, 128, 128>}, {transform_indices = @transform_2, window_bounds = array<i64: 1, 16, 16, 128>}, {transform_indices = @transform_3, window_bounds = array<i64: 1, 2, 128>}]} {
    %0 = tpu.iota {dimensions = array<i32: 0>} : vector<16x128xi32>
    %cst = arith.constant 0.000000e+00 : f32
    %1 = vector.broadcast %cst : f32 to vector<1x128xf32>
    %cst_0 = arith.constant 0.000000e+00 : f32
    %2 = vector.broadcast %cst_0 : f32 to vector<1x128xf32>
    %c0_i32 = arith.constant 0 : i32
    %c16_i32 = arith.constant 16 : i32
    %3 = arith.addi %c0_i32, %c16_i32 : i32
    %c1_i32 = arith.constant 1 : i32
    %4:2 = scf.for %arg5 = %c0_i32 to %3 step %c1_i32 iter_args(%arg6 = %1, %arg7 = %2) -> (vector<1x128xf32>, vector<1x128xf32>)  : i32 {
      %cst_6 = arith.constant 0.000000e+00 : f32
      %11 = vector.broadcast %cst_6 : f32 to vector<16x128xf32>
      %cst_7 = arith.constant 0.000000e+00 : f32
      %12 = vector.broadcast %cst_7 : f32 to vector<16x128xf32>
      %cst_8 = arith.constant 0.000000e+00 : f32
      %13 = vector.broadcast %cst_8 : f32 to vector<16x128xf32>
      %c0_i32_9 = arith.constant 0 : i32
      %14 = arith.addi %arg5, %c0_i32_9 : i32
      %c1_i32_10 = arith.constant 1 : i32
      %15 = arith.subi %14, %c1_i32_10 : i32
      %c0_i32_11 = arith.constant 0 : i32
      %16 = arith.cmpi sge, %15, %c0_i32_11 : i32
      %c15_i32 = arith.constant 15 : i32
      %17 = arith.cmpi sle, %15, %c15_i32 : i32
      %18 = arith.andi %16, %17 : i1
      %c0_i32_12 = arith.constant 0 : i32
      %c15_i32_13 = arith.constant 15 : i32
      %19 = arith.maxsi %c0_i32_12, %15 : i32
      %20 = arith.minsi %c15_i32_13, %19 : i32
      %c0_14 = arith.constant 0 : index
      %21 = arith.index_cast %20 : i32 to index
      %c0_15 = arith.constant 0 : index
      %c0_16 = arith.constant 0 : index
      %22 = vector.load %arg1[%c0_14, %21, %c0_15, %c0_16] : memref<1x16x16x128xf32, #tpu.memory_space<vmem>>, vector<1x1x16x128xf32>
      %23 = vector.shape_cast %22 : vector<1x1x16x128xf32> to vector<16x128xf32>
      %24 = arith.extui %18 : i1 to i32
      %25 = arith.sitofp %24 : i32 to f32
      %26 = vector.broadcast %25 : f32 to vector<16x128xf32>
      %27 = arith.mulf %23, %26 : vector<16x128xf32>
      %c0_17 = arith.constant 0 : index
      %c0_18 = arith.constant 0 : index
      %c0_19 = arith.constant 0 : index
      %28 = vector.load %arg2[%c0_17, %c0_18, %c0_19] : memref<9x128x128xf32, #tpu.memory_space<vmem>>, vector<1x128x128xf32>
      %29 = vector.shape_cast %28 : vector<1x128x128xf32> to vector<128x128xf32>
      %cst_20 = arith.constant dense<0.000000e+00> : vector<16x128xf32>
      %30 = tpu.matmul %27, %29, %cst_20 {dimension_numbers = #tpu.dot_dimension_numbers<[1], [0], [0], [1], [0, 0, 1, 1], [], []>} : vector<16x128xf32>, vector<128x128xf32>, vector<16x128xf32> -> vector<16x128xf32>
      %31 = arith.addf %11, %30 : vector<16x128xf32>
      %c1_21 = arith.constant 1 : index
      %c0_22 = arith.constant 0 : index
      %c0_23 = arith.constant 0 : index
      %32 = vector.load %arg2[%c1_21, %c0_22, %c0_23] : memref<9x128x128xf32, #tpu.memory_space<vmem>>, vector<1x128x128xf32>
      %33 = vector.shape_cast %32 : vector<1x128x128xf32> to vector<128x128xf32>
      %cst_24 = arith.constant dense<0.000000e+00> : vector<16x128xf32>
      %34 = tpu.matmul %27, %33, %cst_24 {dimension_numbers = #tpu.dot_dimension_numbers<[1], [0], [0], [1], [0, 0, 1, 1], [], []>} : vector<16x128xf32>, vector<128x128xf32>, vector<16x128xf32> -> vector<16x128xf32>
      %35 = arith.addf %12, %34 : vector<16x128xf32>
      %c2 = arith.constant 2 : index
      %c0_25 = arith.constant 0 : index
      %c0_26 = arith.constant 0 : index
      %36 = vector.load %arg2[%c2, %c0_25, %c0_26] : memref<9x128x128xf32, #tpu.memory_space<vmem>>, vector<1x128x128xf32>
      %37 = vector.shape_cast %36 : vector<1x128x128xf32> to vector<128x128xf32>
      %cst_27 = arith.constant dense<0.000000e+00> : vector<16x128xf32>
      %38 = tpu.matmul %27, %37, %cst_27 {dimension_numbers = #tpu.dot_dimension_numbers<[1], [0], [0], [1], [0, 0, 1, 1], [], []>} : vector<16x128xf32>, vector<128x128xf32>, vector<16x128xf32> -> vector<16x128xf32>
      %39 = arith.addf %13, %38 : vector<16x128xf32>
      %c1_i32_28 = arith.constant 1 : i32
      %40 = arith.addi %arg5, %c1_i32_28 : i32
      %c1_i32_29 = arith.constant 1 : i32
      %41 = arith.subi %40, %c1_i32_29 : i32
      %c0_i32_30 = arith.constant 0 : i32
      %42 = arith.cmpi sge, %41, %c0_i32_30 : i32
      %c15_i32_31 = arith.constant 15 : i32
      %43 = arith.cmpi sle, %41, %c15_i32_31 : i32
      %44 = arith.andi %42, %43 : i1
      %c0_i32_32 = arith.constant 0 : i32
      %c15_i32_33 = arith.constant 15 : i32
      %45 = arith.maxsi %c0_i32_32, %41 : i32
      %46 = arith.minsi %c15_i32_33, %45 : i32
      %c0_34 = arith.constant 0 : index
      %47 = arith.index_cast %46 : i32 to index
      %c0_35 = arith.constant 0 : index
      %c0_36 = arith.constant 0 : index
      %48 = vector.load %arg1[%c0_34, %47, %c0_35, %c0_36] : memref<1x16x16x128xf32, #tpu.memory_space<vmem>>, vector<1x1x16x128xf32>
      %49 = vector.shape_cast %48 : vector<1x1x16x128xf32> to vector<16x128xf32>
      %50 = arith.extui %44 : i1 to i32
      %51 = arith.sitofp %50 : i32 to f32
      %52 = vector.broadcast %51 : f32 to vector<16x128xf32>
      %53 = arith.mulf %49, %52 : vector<16x128xf32>
      %c3 = arith.constant 3 : index
      %c0_37 = arith.constant 0 : index
      %c0_38 = arith.constant 0 : index
      %54 = vector.load %arg2[%c3, %c0_37, %c0_38] : memref<9x128x128xf32, #tpu.memory_space<vmem>>, vector<1x128x128xf32>
      %55 = vector.shape_cast %54 : vector<1x128x128xf32> to vector<128x128xf32>
      %cst_39 = arith.constant dense<0.000000e+00> : vector<16x128xf32>
      %56 = tpu.matmul %53, %55, %cst_39 {dimension_numbers = #tpu.dot_dimension_numbers<[1], [0], [0], [1], [0, 0, 1, 1], [], []>} : vector<16x128xf32>, vector<128x128xf32>, vector<16x128xf32> -> vector<16x128xf32>
      %57 = arith.addf %31, %56 : vector<16x128xf32>
      %c4 = arith.constant 4 : index
      %c0_40 = arith.constant 0 : index
      %c0_41 = arith.constant 0 : index
      %58 = vector.load %arg2[%c4, %c0_40, %c0_41] : memref<9x128x128xf32, #tpu.memory_space<vmem>>, vector<1x128x128xf32>
      %59 = vector.shape_cast %58 : vector<1x128x128xf32> to vector<128x128xf32>
      %cst_42 = arith.constant dense<0.000000e+00> : vector<16x128xf32>
      %60 = tpu.matmul %53, %59, %cst_42 {dimension_numbers = #tpu.dot_dimension_numbers<[1], [0], [0], [1], [0, 0, 1, 1], [], []>} : vector<16x128xf32>, vector<128x128xf32>, vector<16x128xf32> -> vector<16x128xf32>
      %61 = arith.addf %35, %60 : vector<16x128xf32>
      %c5 = arith.constant 5 : index
      %c0_43 = arith.constant 0 : index
      %c0_44 = arith.constant 0 : index
      %62 = vector.load %arg2[%c5, %c0_43, %c0_44] : memref<9x128x128xf32, #tpu.memory_space<vmem>>, vector<1x128x128xf32>
      %63 = vector.shape_cast %62 : vector<1x128x128xf32> to vector<128x128xf32>
      %cst_45 = arith.constant dense<0.000000e+00> : vector<16x128xf32>
      %64 = tpu.matmul %53, %63, %cst_45 {dimension_numbers = #tpu.dot_dimension_numbers<[1], [0], [0], [1], [0, 0, 1, 1], [], []>} : vector<16x128xf32>, vector<128x128xf32>, vector<16x128xf32> -> vector<16x128xf32>
      %65 = arith.addf %39, %64 : vector<16x128xf32>
      %c2_i32 = arith.constant 2 : i32
      %66 = arith.addi %arg5, %c2_i32 : i32
      %c1_i32_46 = arith.constant 1 : i32
      %67 = arith.subi %66, %c1_i32_46 : i32
      %c0_i32_47 = arith.constant 0 : i32
      %68 = arith.cmpi sge, %67, %c0_i32_47 : i32
      %c15_i32_48 = arith.constant 15 : i32
      %69 = arith.cmpi sle, %67, %c15_i32_48 : i32
      %70 = arith.andi %68, %69 : i1
      %c0_i32_49 = arith.constant 0 : i32
      %c15_i32_50 = arith.constant 15 : i32
      %71 = arith.maxsi %c0_i32_49, %67 : i32
      %72 = arith.minsi %c15_i32_50, %71 : i32
      %c0_51 = arith.constant 0 : index
      %73 = arith.index_cast %72 : i32 to index
      %c0_52 = arith.constant 0 : index
      %c0_53 = arith.constant 0 : index
      %74 = vector.load %arg1[%c0_51, %73, %c0_52, %c0_53] : memref<1x16x16x128xf32, #tpu.memory_space<vmem>>, vector<1x1x16x128xf32>
      %75 = vector.shape_cast %74 : vector<1x1x16x128xf32> to vector<16x128xf32>
      %76 = arith.extui %70 : i1 to i32
      %77 = arith.sitofp %76 : i32 to f32
      %78 = vector.broadcast %77 : f32 to vector<16x128xf32>
      %79 = arith.mulf %75, %78 : vector<16x128xf32>
      %c6 = arith.constant 6 : index
      %c0_54 = arith.constant 0 : index
      %c0_55 = arith.constant 0 : index
      %80 = vector.load %arg2[%c6, %c0_54, %c0_55] : memref<9x128x128xf32, #tpu.memory_space<vmem>>, vector<1x128x128xf32>
      %81 = vector.shape_cast %80 : vector<1x128x128xf32> to vector<128x128xf32>
      %cst_56 = arith.constant dense<0.000000e+00> : vector<16x128xf32>
      %82 = tpu.matmul %79, %81, %cst_56 {dimension_numbers = #tpu.dot_dimension_numbers<[1], [0], [0], [1], [0, 0, 1, 1], [], []>} : vector<16x128xf32>, vector<128x128xf32>, vector<16x128xf32> -> vector<16x128xf32>
      %83 = arith.addf %57, %82 : vector<16x128xf32>
      %c7 = arith.constant 7 : index
      %c0_57 = arith.constant 0 : index
      %c0_58 = arith.constant 0 : index
      %84 = vector.load %arg2[%c7, %c0_57, %c0_58] : memref<9x128x128xf32, #tpu.memory_space<vmem>>, vector<1x128x128xf32>
      %85 = vector.shape_cast %84 : vector<1x128x128xf32> to vector<128x128xf32>
      %cst_59 = arith.constant dense<0.000000e+00> : vector<16x128xf32>
      %86 = tpu.matmul %79, %85, %cst_59 {dimension_numbers = #tpu.dot_dimension_numbers<[1], [0], [0], [1], [0, 0, 1, 1], [], []>} : vector<16x128xf32>, vector<128x128xf32>, vector<16x128xf32> -> vector<16x128xf32>
      %87 = arith.addf %61, %86 : vector<16x128xf32>
      %c8 = arith.constant 8 : index
      %c0_60 = arith.constant 0 : index
      %c0_61 = arith.constant 0 : index
      %88 = vector.load %arg2[%c8, %c0_60, %c0_61] : memref<9x128x128xf32, #tpu.memory_space<vmem>>, vector<1x128x128xf32>
      %89 = vector.shape_cast %88 : vector<1x128x128xf32> to vector<128x128xf32>
      %cst_62 = arith.constant dense<0.000000e+00> : vector<16x128xf32>
      %90 = tpu.matmul %79, %89, %cst_62 {dimension_numbers = #tpu.dot_dimension_numbers<[1], [0], [0], [1], [0, 0, 1, 1], [], []>} : vector<16x128xf32>, vector<128x128xf32>, vector<16x128xf32> -> vector<16x128xf32>
      %91 = arith.addf %65, %90 : vector<16x128xf32>
      %c1_i32_63 = arith.constant 1 : i32
      %92 = vector.broadcast %c1_i32_63 : i32 to vector<16x128xi32>
      %93 = arith.cmpi sge, %0, %92 : vector<16x128xi32>
      %c1_i32_64 = arith.constant 1 : i32
      %94 = tpu.dynamic_rotate %83 by %c1_i32_64 dim 0 : vector<16x128xf32>, i32 -> vector<16x128xf32>
      %cst_65 = arith.constant 0.000000e+00 : f32
      %95 = vector.broadcast %cst_65 : f32 to vector<16x128xf32>
      %96 = arith.select %93, %94, %95 : vector<16x128xi1>, vector<16x128xf32>
      %c14_i32 = arith.constant 14 : i32
      %97 = vector.broadcast %c14_i32 : i32 to vector<16x128xi32>
      %98 = arith.cmpi sle, %0, %97 : vector<16x128xi32>
      %c15_i32_66 = arith.constant 15 : i32
      %99 = tpu.dynamic_rotate %91 by %c15_i32_66 dim 0 : vector<16x128xf32>, i32 -> vector<16x128xf32>
      %cst_67 = arith.constant 0.000000e+00 : f32
      %100 = vector.broadcast %cst_67 : f32 to vector<16x128xf32>
      %101 = arith.select %98, %99, %100 : vector<16x128xi1>, vector<16x128xf32>
      %102 = arith.addf %96, %87 : vector<16x128xf32>
      %103 = arith.addf %102, %101 : vector<16x128xf32>
      %c0_68 = arith.constant 0 : index
      %104 = arith.index_cast %arg5 : i32 to index
      %c0_69 = arith.constant 0 : index
      %c0_70 = arith.constant 0 : index
      %105 = vector.load %arg3[%c0_68, %104, %c0_69, %c0_70] : memref<1x16x16x128xf32, #tpu.memory_space<vmem>>, vector<1x1x16x128xf32>
      %106 = vector.shape_cast %105 : vector<1x1x16x128xf32> to vector<16x128xf32>
      %107 = vector.shape_cast %103 : vector<16x128xf32> to vector<1x1x16x128xf32>
      tpu.vector_store %arg3[%c0_68, %104, %c0_69, %c0_70], %107 {strides = array<i32>} : memref<1x16x16x128xf32, #tpu.memory_space<vmem>>, vector<1x1x16x128xf32>,
      %cst_71 = arith.constant dense<0.000000e+00> : vector<128xf32>
      %108 = vector.multi_reduction <add>, %103, %cst_71 [0] : vector<16x128xf32> to vector<128xf32>
      %109 = vector.shape_cast %108 : vector<128xf32> to vector<1x128xf32>
      %110 = arith.addf %arg6, %109 : vector<1x128xf32>
      %111 = arith.mulf %103, %103 : vector<16x128xf32>
      %cst_72 = arith.constant dense<0.000000e+00> : vector<128xf32>
      %112 = vector.multi_reduction <add>, %111, %cst_72 [0] : vector<16x128xf32> to vector<128xf32>
      %113 = vector.shape_cast %112 : vector<128xf32> to vector<1x128xf32>
      %114 = arith.addf %arg7, %113 : vector<1x128xf32>
      scf.yield %110, %114 : vector<1x128xf32>, vector<1x128xf32>
    }
    %c16_i32_1 = arith.constant 16 : i32
    %c0 = arith.constant 0 : index
    %c0_2 = arith.constant 0 : index
    %c0_3 = arith.constant 0 : index
    %5 = vector.load %arg4[%c0, %c0_2, %c0_3] : memref<1x2x128xf32, #tpu.memory_space<vmem>>, vector<1x1x128xf32>
    %6 = vector.shape_cast %5 : vector<1x1x128xf32> to vector<1x128xf32>
    %7 = vector.shape_cast %4#0 : vector<1x128xf32> to vector<1x1x128xf32>
    tpu.vector_store %arg4[%c0, %c0_2, %c0_3], %7 {strides = array<i32>} : memref<1x2x128xf32, #tpu.memory_space<vmem>>, vector<1x1x128xf32>,
    %c0_4 = arith.constant 0 : index
    %c1 = arith.constant 1 : index
    %c0_5 = arith.constant 0 : index
    %8 = vector.load %arg4[%c0_4, %c1, %c0_5] : memref<1x2x128xf32, #tpu.memory_space<vmem>>, vector<1x1x128xf32>
    %9 = vector.shape_cast %8 : vector<1x1x128xf32> to vector<1x128xf32>
    %10 = vector.shape_cast %4#1 : vector<1x128xf32> to vector<1x1x128xf32>
    tpu.vector_store %arg4[%c0_4, %c1, %c0_5], %10 {strides = array<i32>} : memref<1x2x128xf32, #tpu.memory_space<vmem>>, vector<1x1x128xf32>,
    return
  }
  func.func @transform_0(%arg0: i32) -> (i32, i32, i32, i32) {
    %c0_i32 = arith.constant 0 : i32
    %c0_i32_0 = arith.constant 0 : i32
    %c0_i32_1 = arith.constant 0 : i32
    %c0_i32_2 = arith.constant 0 : i32
    return %arg0, %c0_i32, %c0_i32_0, %c0_i32_1 : i32, i32, i32, i32
  }
  func.func @transform_1(%arg0: i32) -> (i32, i32, i32) {
    %c0_i32 = arith.constant 0 : i32
    %c0_i32_0 = arith.constant 0 : i32
    %c0_i32_1 = arith.constant 0 : i32
    %c0_i32_2 = arith.constant 0 : i32
    return %c0_i32, %c0_i32_0, %c0_i32_1 : i32, i32, i32
  }
  func.func @transform_2(%arg0: i32) -> (i32, i32, i32, i32) {
    %c0_i32 = arith.constant 0 : i32
    %c0_i32_0 = arith.constant 0 : i32
    %c0_i32_1 = arith.constant 0 : i32
    %c0_i32_2 = arith.constant 0 : i32
    return %arg0, %c0_i32, %c0_i32_0, %c0_i32_1 : i32, i32, i32, i32
  }
  func.func @transform_3(%arg0: i32) -> (i32, i32, i32) {
    %c0_i32 = arith.constant 0 : i32
    %c0_i32_0 = arith.constant 0 : i32
    %c0_i32_1 = arith.constant 0 : i32
    return %arg0, %c0_i32, %c0_i32_0 : i32, i32, i32
  }
}

</mosaic_0001>

<bundles_post_ra>
// kernel: decoder_block_forward.5
= control target key start
LH: loop header
LB: loop body
LE: loop exit
PB: predicated region body
PF: predicated region fallthrough
CT: control target
= control target key end

     0   :  { %s522_s1 = inlined_call_operand.vmem [shape: f32[128,128], index: 1, kind: input, shape index: {}]   ;;  %s523_s0 = inlined_call_operand.vmem [shape: f32[128,128], index: 0, kind: input, shape index: {}]   ;;  %s524_s2 = inlined_call_operand.vmem [shape: f32[1,128], index: 2, kind: input, shape index: {}]   ;;  %s525_s3 = inlined_call_operand.vmem [shape: f32[128,128], index: 3, kind: output, shape index: {}]  }
   0x1   :  { %v30_v0 = vld [vmem:[%s522_s1] sm:$0xff]  ;;  %v31_v1 = vld [vmem:[%s522_s1 + $0x8] sm:$0xff]  ;;  %v32_v2 = vld [vmem:[%s522_s1 + $0x10] sm:$0xff] }
   0x2   :  { %v307_v3 = vpack.c.bf16 %v31_v1, %v30_v0  ;;  %v33_v4 = vld [vmem:[%s522_s1 + $0x18] sm:$0xff]  ;;  %v34_v6 = vld [vmem:[%s522_s1 + $0x20] sm:$0xff]  ;;  %v35_v7 = vld [vmem:[%s522_s1 + $0x28] sm:$0xff] }
   0x3   :  { %v311_v5 = vpack.c.bf16 %v33_v4, %v32_v2  ;;  %v315_v8 = vpack.c.bf16 %v35_v7, %v34_v6  ;;  %v14_v9 = vld [vmem:[%s523_s0] sm:$0xff]  ;;  %v36_v11 = vld [vmem:[%s522_s1 + $0x30] sm:$0xff]  ;;  %v37_v12 = vld [vmem:[%s522_s1 + $0x38] sm:$0xff] }
   0x4   :  { %308 = vmatprep.subr.bf16.mxu0 %v307_v3  ;;  %339 = vmatprep.subr.bf16.mxu1 %v307_v3  ;;  %v22_v10 = vld [vmem:[%s523_s0 + $0x40] sm:$0xff]  ;;  %v319_v13 = vpack.c.bf16 %v37_v12, %v36_v11  ;;  %v39_v15 = vld [vmem:[%s522_s1 + $0x48] sm:$0xff]  ;;  %v40_v17 = vld [vmem:[%s522_s1 + $0x50] sm:$0xff] }
   0x5   :  { %310 = vmatpush3.bf16.msra.mxu0 %v307_v3  ;;  %347 = vmatpush3.bf16.msra.mxu1 %v307_v3  ;;  %v38_v14 = vld [vmem:[%s522_s1 + $0x40] sm:$0xff]  ;;  %v41_v18 = vld [vmem:[%s522_s1 + $0x58] sm:$0xff]  ;;  %v43_v21 = vld [vmem:[%s522_s1 + $0x68] sm:$0xff] }
   0x6   :  { %312 = vmatprep.subr.bf16.mxu0 %v311_v5  ;;  %340 = vmatprep.subr.bf16.mxu1 %v311_v5  ;;  %v323_v16 = vpack.c.bf16 %v39_v15, %v38_v14  ;;  %v327_v19 = vpack.c.bf16 %v41_v18, %v40_v17  ;;  %v42_v20 = vld [vmem:[%s522_s1 + $0x60] sm:$0xff]  ;;  %v44_v23 = vld [vmem:[%s522_s1 + $0x70] sm:$0xff]  ;;  %v45_v24 = vld [vmem:[%s522_s1 + $0x78] sm:$0xff] }
   0x7   :  { %283 = vmatprep.mubr.f32.mxu0 %v14_v9  ;;  %295 = vmatprep.mubr.f32.mxu1 %v22_v10  ;;  %v331_v22 = vpack.c.bf16 %v43_v21, %v42_v20  ;;  %v335_v25 = vpack.c.bf16 %v45_v24, %v44_v23  ;;  %v15_v26 = vld [vmem:[%s523_s0 + $0x8] sm:$0xff]  ;;  %v16_v28 = vld [vmem:[%s523_s0 + $0x10] sm:$0xff]  ;;  %v17_v30 = vld [vmem:[%s523_s0 + $0x18] sm:$0xff] }
   0x8   :  { %v23_v27 = vld [vmem:[%s523_s0 + $0x48] sm:$0xff]  ;;  %v24_v29 = vld [vmem:[%s523_s0 + $0x50] sm:$0xff]  ;;  %v25_v31 = vld [vmem:[%s523_s0 + $0x58] sm:$0xff] }
   0x9   :  { %314 = vmatpush3.bf16.msra.mxu0 %v311_v5  ;;  %348 = vmatpush3.bf16.msra.mxu1 %v311_v5  ;;  %v18_v32 = vld [vmem:[%s523_s0 + $0x20] sm:$0xff]  ;;  %v19_v34 = vld [vmem:[%s523_s0 + $0x28] sm:$0xff]  ;;  %v20_v36 = vld [vmem:[%s523_s0 + $0x30] sm:$0xff] }
   0xa   :  { %316 = vmatprep.subr.bf16.mxu0 %v315_v8  ;;  %341 = vmatprep.subr.bf16.mxu1 %v315_v8  ;;  %v26_v33 = vld [vmem:[%s523_s0 + $0x60] sm:$0xff]  ;;  %v27_v35 = vld [vmem:[%s523_s0 + $0x68] sm:$0xff]  ;;  %v28_v37 = vld [vmem:[%s523_s0 + $0x70] sm:$0xff] }
   0xb   :  { %v21_v38 = vld [vmem:[%s523_s0 + $0x38] sm:$0xff]  ;;  %v218_v40 = vld [vmem:[%s524_s2] ss:$0 sm:$0xff] }
   0xc   :  { %v29_v39 = vld [vmem:[%s523_s0 + $0x78] sm:$0xff] }
   0xd   :  { %318 = vmatpush3.bf16.msra.mxu0 %v315_v8  ;;  %349 = vmatpush3.bf16.msra.mxu1 %v315_v8 }
   0xe   :  { %320 = vmatprep.subr.bf16.mxu0 %v319_v13  ;;  %342 = vmatprep.subr.bf16.mxu1 %v319_v13 }
  0x11   :  { %322 = vmatpush3.bf16.msra.mxu0 %v319_v13  ;;  %350 = vmatpush3.bf16.msra.mxu1 %v319_v13 }
  0x12   :  { %324 = vmatprep.subr.bf16.mxu0 %v323_v16  ;;  %343 = vmatprep.subr.bf16.mxu1 %v323_v16 }
  0x15   :  { %326 = vmatpush3.bf16.msra.mxu0 %v323_v16  ;;  %351 = vmatpush3.bf16.msra.mxu1 %v323_v16 }
  0x16   :  { %328 = vmatprep.subr.bf16.mxu0 %v327_v19  ;;  %344 = vmatprep.subr.bf16.mxu1 %v327_v19 }
  0x19   :  { %330 = vmatpush3.bf16.msra.mxu0 %v327_v19  ;;  %352 = vmatpush3.bf16.msra.mxu1 %v327_v19 }
  0x1a   :  { %332 = vmatprep.subr.bf16.mxu0 %v331_v22  ;;  %345 = vmatprep.subr.bf16.mxu1 %v331_v22 }
  0x1d   :  { %334 = vmatpush3.bf16.msra.mxu0 %v331_v22  ;;  %353 = vmatpush3.bf16.msra.mxu1 %v331_v22 }
  0x1e   :  { %336 = vmatprep.subr.bf16.mxu0 %v335_v25  ;;  %346 = vmatprep.subr.bf16.mxu1 %v335_v25 }
  0x21   :  { %338 = vmatpush3.bf16.msra.mxu0 %v335_v25  ;;  %354 = vmatpush3.bf16.msra.mxu1 %v335_v25 }
  0x24   :  { %284 = vmatmul.mubr.f32.vlgmr.msra.gmra.mrb[0].mxu0 %v15_v26  ;;  %296 = vmatmul.mubr.f32.vlgmr.msra.gmra.mrb[0].mxu1 %v23_v27 }
  0x25   :  { %286 = vmatprep.mubr.f32.mxu0 %v16_v28  ;;  %298 = vmatprep.mubr.f32.mxu1 %v24_v29 }
  0x28   :  { %287 = vmatmul.mubr.f32.gmra.mrb[2].mxu0 %v17_v30  ;;  %299 = vmatmul.mubr.f32.gmra.mrb[2].mxu1 %v25_v31 }
  0x29   :  { %289 = vmatprep.mubr.f32.mxu0 %v18_v32  ;;  %301 = vmatprep.mubr.f32.mxu1 %v26_v33 }
  0x2c   :  { %290 = vmatmul.mubr.f32.gmra.mrb[4].mxu0 %v19_v34  ;;  %302 = vmatmul.mubr.f32.gmra.mrb[4].mxu1 %v27_v35 }
  0x2d   :  { %292 = vmatprep.mubr.f32.mxu0 %v20_v36  ;;  %304 = vmatprep.mubr.f32.mxu1 %v28_v37 }
  0x30   :  { %293 = vmatmul.mubr.f32.gmra.mrb[6].mxu0 %v21_v38  ;;  %305 = vmatmul.mubr.f32.gmra.mrb[6].mxu1 %v29_v39 }
  0xf7   :  { %v285_v41 = vpop.f32.mrb[0].mxu0  ;;  %v297_v42 = vpop.f32.mrb[0].mxu1 }
  0xf8   :  { %v125_v43 = vadd.f32 %v285_v41, %v218_v40  ;;  %v165_v44 = vadd.f32 %v297_v42, %v218_v40  ;;  %v119_v45 = vpop.f32.mrb[1].mxu0  ;;  %v159_v46 = vpop.f32.mrb[1].mxu1 }
  0xf9   :  { %v120_v47 = vadd.f32 %v218_v40, %v119_v45  ;;  %v160_v48 = vadd.f32 %v218_v40, %v159_v46 }
  0xfa   :  { %199 = vst [vmem:[%s525_s3 + $0x8] sm:$0xff] %v125_v43  ;;  %207 = vst [vmem:[%s525_s3 + $0x48] sm:$0xff] %v165_v44 }
  0xfb   :  { %198 = vst [vmem:[%s525_s3] sm:$0xff] %v120_v47  ;;  %206 = vst [vmem:[%s525_s3 + $0x40] sm:$0xff] %v160_v48  ;;  %v288_v49 = vpop.f32.mrb[2].mxu0  ;;  %v300_v50 = vpop.f32.mrb[2].mxu1 }
  0xfc   :  { %v135_v51 = vadd.f32 %v288_v49, %v218_v40  ;;  %v175_v52 = vadd.f32 %v300_v50, %v218_v40  ;;  %v129_v53 = vpop.f32.mrb[3].mxu0  ;;  %v169_v54 = vpop.f32.mrb[3].mxu1 }
  0xfd   :  { %v130_v55 = vadd.f32 %v218_v40, %v129_v53  ;;  %v170_v56 = vadd.f32 %v218_v40, %v169_v54 }
  0xfe   :  { %201 = vst [vmem:[%s525_s3 + $0x18] sm:$0xff] %v135_v51  ;;  %209 = vst [vmem:[%s525_s3 + $0x58] sm:$0xff] %v175_v52 }
  0xff   :  { %200 = vst [vmem:[%s525_s3 + $0x10] sm:$0xff] %v130_v55  ;;  %208 = vst [vmem:[%s525_s3 + $0x50] sm:$0xff] %v170_v56  ;;  %v291_v57 = vpop.f32.mrb[4].mxu0  ;;  %v303_v58 = vpop.f32.mrb[4].mxu1 }
 0x100   :  { %v145_v59 = vadd.f32 %v291_v57, %v218_v40  ;;  %v185_v60 = vadd.f32 %v303_v58, %v218_v40  ;;  %v139_v61 = vpop.f32.mrb[5].mxu0  ;;  %v179_v62 = vpop.f32.mrb[5].mxu1 }
 0x101   :  { %v140_v63 = vadd.f32 %v218_v40, %v139_v61  ;;  %v180_v0 = vadd.f32 %v218_v40, %v179_v62 }
 0x102   :  { %203 = vst [vmem:[%s525_s3 + $0x28] sm:$0xff] %v145_v59  ;;  %211 = vst [vmem:[%s525_s3 + $0x68] sm:$0xff] %v185_v60 }
 0x103   :  { %202 = vst [vmem:[%s525_s3 + $0x20] sm:$0xff] %v140_v63  ;;  %210 = vst [vmem:[%s525_s3 + $0x60] sm:$0xff] %v180_v0  ;;  %v294_v1 = vpop.f32.mrb[6].mxu0  ;;  %v306_v2 = vpop.f32.mrb[6].mxu1 }
 0x104   :  { %v155_v3 = vadd.f32 %v294_v1, %v218_v40  ;;  %v195_v4 = vadd.f32 %v306_v2, %v218_v40  ;;  %v149_v5 = vpop.f32.mrb[7].mxu0  ;;  %v189_v6 = vpop.f32.mrb[7].mxu1 }
 0x105   :  { %v150_v7 = vadd.f32 %v218_v40, %v149_v5  ;;  %v190_v8 = vadd.f32 %v218_v40, %v189_v6 }
 0x106   :  { %205 = vst [vmem:[%s525_s3 + $0x38] sm:$0xff] %v155_v3  ;;  %213 = vst [vmem:[%s525_s3 + $0x78] sm:$0xff] %v195_v4 }
 0x107   :  { %204 = vst [vmem:[%s525_s3 + $0x30] sm:$0xff] %v150_v7  ;;  %212 = vst [vmem:[%s525_s3 + $0x70] sm:$0xff] %v190_v8 }

// kernel: decoder_block_forward.7
= control target key start
LH: loop header
LB: loop body
LE: loop exit
PB: predicated region body
PF: predicated region fallthrough
CT: control target
= control target key end

     0   :  { %s415_s9 = smov 0   ;;  %s605_s0 = inlined_call_operand.vmem [shape: f32[2,16,16,128], index: 0, kind: input, shape index: {}, may-alias: {0,2}]   ;;  %s606_s1 = inlined_call_operand.vmem [shape: f32[2,128], index: 1, kind: input, shape index: {}]   ;;  %s607_s2 = inlined_call_operand.vmem [shape: f32[2,16,16,128], index: 2, kind: output, shape index: {}, may-alias: {0,2}]  }
   0x1 LB: > { %s369_s10 = sadd.s32 4294967295, %s398_s9   ;;  %p373_p0 = scmp.ge.s32.totalorder %s398_s9, 1  ;;  %s398_s9 = sphi %s415_s9, %s12_s9  }
   0x2   : > { %p112_p1 = scmp.lt.s32.totalorder %s398_s9, 3 }
   0x4   : > { %p113_p2 = pnand %p373_p0, %p112_p1 }
   0x5   : > { %p134_p3 = scmp.lt.s32.totalorder (!%p113_p2), %s369_s10, 1  ;;  %v429_v0 = vld [vmem:[%s606_s1] ss:$0 sm:$0xff] (!%p113_p2)  ;;  %v441_v1 = vld [vmem:[%s606_s1 + $0x1] ss:$0 sm:$0xff] (!%p113_p2) }
   0x6   : > { %116 = sbr.rel (%p113_p2) target bundleno = 46 (0x2e), region = 28 }
   0xd   : > { %s609_s10 = smov (!%p134_p3, %s369_s10), 1 }
   0xe   : > { %s382_s11 = sshll.u32 %s609_s10, 8 }
   0xf   : > { %s436_s16 = scalar_lea.vmem %s605_s0, %s382_s11  ;;  %s483_s21 = scalar_lea.vmem %s607_s2, %s382_s11 }
  0x10   : > { %v146_v2 = vld [vmem:[%s436_s16] sm:$0xff]  ;;  %v147_v3 = vld [vmem:[%s436_s16 + $0x8] sm:$0xff]  ;;  %v148_v4 = vld [vmem:[%s436_s16 + $0x10] sm:$0xff] }
  0x11   : > { %v149_v5 = vld [vmem:[%s436_s16 + $0x18] sm:$0xff]  ;;  %v150_v6 = vld [vmem:[%s436_s16 + $0x20] sm:$0xff]  ;;  %v151_v7 = vld [vmem:[%s436_s16 + $0x28] sm:$0xff]  ;;  %v182_v8 = vmul.f32 %v429_v0, %v146_v2  ;;  %v183_v9 = vmul.f32 %v429_v0, %v147_v3  ;;  %v184_v10 = vmul.f32 %v429_v0, %v148_v4 }
  0x12   : > { %v152_v11 = vld [vmem:[%s436_s16 + $0x30] sm:$0xff]  ;;  %v153_v12 = vld [vmem:[%s436_s16 + $0x38] sm:$0xff]  ;;  %v185_v13 = vmul.f32 %v429_v0, %v149_v5  ;;  %v186_v14 = vmul.f32 %v429_v0, %v150_v6  ;;  %v187_v15 = vmul.f32 %v429_v0, %v151_v7  ;;  %v154_v20 = vld [vmem:[%s436_s16 + $0x40] sm:$0xff] }
  0x13   : > { %v218_v16 = vadd.f32 %v441_v1, %v182_v8  ;;  %v219_v17 = vadd.f32 %v441_v1, %v183_v9  ;;  %v220_v18 = vadd.f32 %v441_v1, %v184_v10  ;;  %v188_v19 = vmul.f32 %v429_v0, %v152_v11  ;;  %v155_v21 = vld [vmem:[%s436_s16 + $0x48] sm:$0xff]  ;;  %v156_v22 = vld [vmem:[%s436_s16 + $0x50] sm:$0xff]  ;;  %v157_v27 = vld [vmem:[%s436_s16 + $0x58] sm:$0xff] }
  0x14   : > { %v221_v23 = vadd.f32 %v441_v1, %v185_v13  ;;  %v222_v24 = vadd.f32 %v441_v1, %v186_v14  ;;  %v223_v25 = vadd.f32 %v441_v1, %v187_v15  ;;  %v189_v26 = vmul.f32 %v429_v0, %v153_v12  ;;  %v158_v28 = vld [vmem:[%s436_s16 + $0x60] sm:$0xff]  ;;  %v159_v29 = vld [vmem:[%s436_s16 + $0x68] sm:$0xff]  ;;  %v160_v34 = vld [vmem:[%s436_s16 + $0x70] sm:$0xff] }
  0x15   : > { %v250_v30 = vmax.f32 %v218_v16, 0.0  ;;  %v251_v31 = vmax.f32 %v219_v17, 0.0  ;;  %v252_v32 = vmax.f32 %v220_v18, 0.0  ;;  %v224_v33 = vadd.f32 %v441_v1, %v188_v19  ;;  %v161_v39 = vld [vmem:[%s436_s16 + $0x78] sm:$0xff]  ;;  %v162_v44 = vld [vmem:[%s436_s16 + $0x80] sm:$0xff]  ;;  %v163_v45 = vld [vmem:[%s436_s16 + $0x88] sm:$0xff] }
  0x16   : > { %v253_v35 = vmax.f32 %v221_v23, 0.0  ;;  %v254_v36 = vmax.f32 %v222_v24, 0.0  ;;  %v255_v37 = vmax.f32 %v223_v25, 0.0  ;;  %v225_v38 = vadd.f32 %v441_v1, %v189_v26  ;;  %v164_v46 = vld [vmem:[%s436_s16 + $0x90] sm:$0xff]  ;;  %v165_v47 = vld [vmem:[%s436_s16 + $0x98] sm:$0xff]  ;;  %v166_v48 = vld [vmem:[%s436_s16 + $0xa0] sm:$0xff] }
  0x17   : > { %v256_v40 = vmax.f32 %v224_v33, 0.0  ;;  %v190_v41 = vmul.f32 %v429_v0, %v154_v20  ;;  %v191_v42 = vmul.f32 %v429_v0, %v155_v21  ;;  %v192_v43 = vmul.f32 %v429_v0, %v156_v22  ;;  %v167_v49 = vld [vmem:[%s436_s16 + $0xa8] sm:$0xff]  ;;  %v168_v50 = vld [vmem:[%s436_s16 + $0xb0] sm:$0xff]  ;;  %v169_v51 = vld [vmem:[%s436_s16 + $0xb8] sm:$0xff] }
  0x18   : > { %v494_v52 = vld [vmem:[%s436_s16 + $0xc0] sm:$0xff]  ;;  %v497_v53 = vld [vmem:[%s436_s16 + $0xc8] sm:$0xff]  ;;  %v257_v54 = vmax.f32 %v225_v38, 0.0  ;;  %v193_v55 = vmul.f32 %v429_v0, %v157_v27  ;;  %v194_v56 = vmul.f32 %v429_v0, %v158_v28  ;;  %v195_v57 = vmul.f32 %v429_v0, %v159_v29  ;;  %v503_v58 = vld [vmem:[%s436_s16 + $0xd0] sm:$0xff] }
  0x19   : > { %v506_v59 = vld [vmem:[%s436_s16 + $0xd8] sm:$0xff]  ;;  %v509_v60 = vld [vmem:[%s436_s16 + $0xe0] sm:$0xff]  ;;  %v226_v61 = vadd.f32 %v441_v1, %v190_v41  ;;  %v227_v62 = vadd.f32 %v441_v1, %v191_v42  ;;  %v228_v63 = vadd.f32 %v441_v1, %v192_v43  ;;  %v196_v2 = vmul.f32 %v429_v0, %v160_v34  ;;  %v516_v3 = vld [vmem:[%s436_s16 + $0xe8] sm:$0xff] }
  0x1a   : > { %v519_v4 = vld [vmem:[%s436_s16 + $0xf0] sm:$0xff]  ;;  %v522_v5 = vld [vmem:[%s436_s16 + $0xf8] sm:$0xff]  ;;  %v229_v6 = vadd.f32 %v441_v1, %v193_v55  ;;  %v230_v7 = vadd.f32 %v441_v1, %v194_v56  ;;  %v231_v8 = vadd.f32 %v441_v1, %v195_v57  ;;  %v197_v9 = vmul.f32 %v429_v0, %v161_v39 }
  0x1b   : > { %282 = vst [vmem:[%s483_s21] sm:$0xff] %v250_v30  ;;  %283 = vst [vmem:[%s483_s21 + $0x8] sm:$0xff] %v251_v31  ;;  %v258_v10 = vmax.f32 %v226_v61, 0.0  ;;  %v259_v11 = vmax.f32 %v227_v62, 0.0  ;;  %v260_v12 = vmax.f32 %v228_v63, 0.0  ;;  %v232_v13 = vadd.f32 %v441_v1, %v196_v2 }
  0x1c   : > { %284 = vst [vmem:[%s483_s21 + $0x10] sm:$0xff] %v252_v32  ;;  %285 = vst [vmem:[%s483_s21 + $0x18] sm:$0xff] %v253_v35  ;;  %v261_v14 = vmax.f32 %v229_v6, 0.0  ;;  %v262_v15 = vmax.f32 %v230_v7, 0.0  ;;  %v263_v16 = vmax.f32 %v231_v8, 0.0  ;;  %v233_v17 = vadd.f32 %v441_v1, %v197_v9 }
  0x1d   : > { %286 = vst [vmem:[%s483_s21 + $0x20] sm:$0xff] %v254_v36  ;;  %287 = vst [vmem:[%s483_s21 + $0x28] sm:$0xff] %v255_v37  ;;  %v264_v18 = vmax.f32 %v232_v13, 0.0  ;;  %v198_v19 = vmul.f32 %v429_v0, %v162_v44  ;;  %v199_v20 = vmul.f32 %v429_v0, %v163_v45  ;;  %v200_v21 = vmul.f32 %v429_v0, %v164_v46 }
  0x1e   : > { %288 = vst [vmem:[%s483_s21 + $0x30] sm:$0xff] %v256_v40  ;;  %289 = vst [vmem:[%s483_s21 + $0x38] sm:$0xff] %v257_v54  ;;  %v265_v22 = vmax.f32 %v233_v17, 0.0  ;;  %v201_v23 = vmul.f32 %v429_v0, %v165_v47  ;;  %v202_v24 = vmul.f32 %v429_v0, %v166_v48  ;;  %v203_v25 = vmul.f32 %v429_v0, %v167_v49 }
  0x1f   : > { %290 = vst [vmem:[%s483_s21 + $0x40] sm:$0xff] %v258_v10  ;;  %291 = vst [vmem:[%s483_s21 + $0x48] sm:$0xff] %v259_v11  ;;  %v234_v26 = vadd.f32 %v441_v1, %v198_v19  ;;  %v235_v27 = vadd.f32 %v441_v1, %v199_v20  ;;  %v236_v28 = vadd.f32 %v441_v1, %v200_v21 }
  0x20   : > { %292 = vst [vmem:[%s483_s21 + $0x50] sm:$0xff] %v260_v12  ;;  %293 = vst [vmem:[%s483_s21 + $0x58] sm:$0xff] %v261_v14  ;;  %v204_v29 = vmul.f32 %v429_v0, %v168_v50  ;;  %v237_v30 = vadd.f32 %v441_v1, %v201_v23  ;;  %v238_v31 = vadd.f32 %v441_v1, %v202_v24 }
  0x21   : > { %294 = vst [vmem:[%s483_s21 + $0x60] sm:$0xff] %v262_v15  ;;  %295 = vst [vmem:[%s483_s21 + $0x68] sm:$0xff] %v263_v16  ;;  %v239_v32 = vadd.f32 %v441_v1, %v203_v25  ;;  %v205_v33 = vmul.f32 %v429_v0, %v169_v51  ;;  %v266_v34 = vmax.f32 %v234_v26, 0.0  ;;  %v267_v35 = vmax.f32 %v235_v27, 0.0 }
  0x22   : > { %296 = vst [vmem:[%s483_s21 + $0x70] sm:$0xff] %v264_v18  ;;  %297 = vst [vmem:[%s483_s21 + $0x78] sm:$0xff] %v265_v22  ;;  %v268_v36 = vmax.f32 %v236_v28, 0.0  ;;  %v240_v37 = vadd.f32 %v441_v1, %v204_v29  ;;  %v269_v38 = vmax.f32 %v237_v30, 0.0  ;;  %v270_v39 = vmax.f32 %v238_v31, 0.0 }
  0x23   : > { %v271_v40 = vmax.f32 %v239_v32, 0.0  ;;  %v241_v41 = vadd.f32 %v441_v1, %v205_v33  ;;  %298 = vst [vmem:[%s483_s21 + $0x80] sm:$0xff] %v266_v34  ;;  %299 = vst [vmem:[%s483_s21 + $0x88] sm:$0xff] %v267_v35  ;;  %v206_v43 = vmul.f32 %v429_v0, %v494_v52  ;;  %v207_v44 = vmul.f32 %v429_v0, %v497_v53 }
  0x24   : > { %300 = vst [vmem:[%s483_s21 + $0x90] sm:$0xff] %v268_v36  ;;  %v272_v42 = vmax.f32 %v240_v37, 0.0  ;;  %v208_v45 = vmul.f32 %v429_v0, %v503_v58  ;;  %301 = vst [vmem:[%s483_s21 + $0x98] sm:$0xff] %v269_v38  ;;  %v209_v47 = vmul.f32 %v429_v0, %v506_v59  ;;  %v210_v48 = vmul.f32 %v429_v0, %v509_v60 }
  0x25   : > { %302 = vst [vmem:[%s483_s21 + $0xa0] sm:$0xff] %v270_v39  ;;  %303 = vst [vmem:[%s483_s21 + $0xa8] sm:$0xff] %v271_v40  ;;  %v273_v46 = vmax.f32 %v241_v41, 0.0  ;;  %v211_v49 = vmul.f32 %v429_v0, %v516_v3  ;;  %v242_v50 = vadd.f32 %v441_v1, %v206_v43  ;;  %v243_v51 = vadd.f32 %v441_v1, %v207_v44 }
  0x26   : > { %304 = vst [vmem:[%s483_s21 + $0xb0] sm:$0xff] %v272_v42  ;;  %v244_v52 = vadd.f32 %v441_v1, %v208_v45  ;;  %v212_v53 = vmul.f32 %v429_v0, %v519_v4  ;;  %v245_v54 = vadd.f32 %v441_v1, %v209_v47  ;;  %v246_v55 = vadd.f32 %v441_v1, %v210_v48 }
  0x27   : > { %305 = vst [vmem:[%s483_s21 + $0xb8] sm:$0xff] %v273_v46  ;;  %v247_v56 = vadd.f32 %v441_v1, %v211_v49  ;;  %v213_v57 = vmul.f32 %v429_v0, %v522_v5  ;;  %v274_v58 = vmax.f32 %v242_v50, 0.0  ;;  %v275_v59 = vmax.f32 %v243_v51, 0.0 }
  0x28   : > { %v276_v60 = vmax.f32 %v244_v52, 0.0  ;;  %v248_v61 = vadd.f32 %v441_v1, %v212_v53  ;;  %v277_v62 = vmax.f32 %v245_v54, 0.0  ;;  %v278_v63 = vmax.f32 %v246_v55, 0.0 }
  0x29   : > { %v279_v2 = vmax.f32 %v247_v56, 0.0  ;;  %v249_v3 = vadd.f32 %v441_v1, %v213_v57  ;;  %306 = vst [vmem:[%s483_s21 + $0xc0] sm:$0xff] %v274_v58  ;;  %307 = vst [vmem:[%s483_s21 + $0xc8] sm:$0xff] %v275_v59 }
  0x2a   : > { %308 = vst [vmem:[%s483_s21 + $0xd0] sm:$0xff] %v276_v60  ;;  %v280_v4 = vmax.f32 %v248_v61, 0.0  ;;  %309 = vst [vmem:[%s483_s21 + $0xd8] sm:$0xff] %v277_v62 }
  0x2b   : > { %310 = vst [vmem:[%s483_s21 + $0xe0] sm:$0xff] %v278_v63  ;;  %311 = vst [vmem:[%s483_s21 + $0xe8] sm:$0xff] %v279_v2  ;;  %v281_v0 = vmax.f32 %v249_v3, 0.0 }
  0x2c   : > { %312 = vst [vmem:[%s483_s21 + $0xf0] sm:$0xff] %v280_v4 }
  0x2d   : > { %313 = vst [vmem:[%s483_s21 + $0xf8] sm:$0xff] %v281_v0 }
  0x2e PF: > { %s12_s9 = sadd.s32 1, %s398_s9  }
  0x2f   : > { %p9_p4 = scmp.ge.s32.totalorder %s12_s9, 4  }
  0x31   :  { %11 = sbr.rel (!%p9_p4) target bundleno = 1 (0x1), region = 58 }

// kernel: decoder_block_forward.6
= control target key start
LH: loop header
LB: loop body
LE: loop exit
PB: predicated region body
PF: predicated region fallthrough
CT: control target
= control target key end

     0   :  { %s1350_s12 = smov 0   ;;  %s1484_s0 = inlined_call_operand.vmem [shape: f32[2,16,16,8], index: 0, kind: input, shape index: {}]   ;;  %s1485_s1 = inlined_call_operand.vmem [shape: f32[9,8,128], index: 1, kind: input, shape index: {}]   ;;  %s1486_s2 = inlined_call_operand.vmem [shape: f32[2,16,16,128], index: 2, kind: output, shape index: {0}]   ;;  %s1487_s3 = inlined_call_operand.vmem [shape: f32[2,2,128], index: 3, kind: output, shape index: {1}]  }
   0x1 LB: > { %s1114_s13 = sadd.s32 4294967295, %s1316_s12   ;;  %p1118_p0 = scmp.ge.s32.totalorder %s1316_s12, 1  ;;  %s1316_s12 = sphi %s1350_s12, %s14_s12  }
   0x2   : > { %p140_p1 = scmp.lt.s32.totalorder %s1316_s12, 3 }
   0x4   : > { %p141_p2 = pnand %p1118_p0, %p140_p1 }
   0x5   : > { %p168_p3 = scmp.lt.s32.totalorder (!%p141_p2), %s1114_s13, 1  ;;  %v182_v0 = vlaneseq (!%p141_p2)  ;;  %v1378_v3 = vmov (!%p141_p2), 0.0   ;;  %v1380_v4 = vmov (!%p141_p2), 0.0   ;;  %s1382_s25 = smov (!%p141_p2), 0  }
   0x6   : > { %144 = sbr.rel (%p141_p2) target bundleno = 294 (0x126), region = 28 }
   0x7   : > { %v1358_v1 = vshrl.u32 (!%p141_p2), %v182_v0, 7 }
   0x9   : > { %v1361_v2 = vadd.s32 (!%p141_p2), 8, %v1358_v1 }
   0xd   : > { %s1492_s13 = smov (!%p168_p3, %s1114_s13), 1 }
   0xe   : > { %s1174_s14 = sshll.u32 %s1492_s13, 8  ;;  %s1123_s15 = sshll.u32 %s1492_s13, 1 }
   0xf   : > { %s1366_s18 = scalar_lea.vmem %s1484_s0, %s1174_s14  ;;  %s1371_s21 = scalar_lea.vmem %s1486_s2, %s1174_s14 }
  0x10   : > { %s1376_s24 = scalar_lea.vmem %s1487_s3, %s1123_s15 }
  0x11 LB: >> { %v1140_v5 = vld [vmem:[%s1485_s1 + $0x18] sm:$0xff]  ;;  %v211_v6 = vld [vmem:[%s1485_s1] sm:$0xff]  ;;  %v1402_v7 = vld [vmem:[%s1485_s1 + $0x28] sm:$0xff]  ;;  %p216_p4 = scmp.ge.s32.totalorder %s1328_s25, 0  ;;  %p217_p5 = scmp.le.s32.totalorder %s1328_s25, 15  ;;  %vm235_vm0 = vcmask 64512   ;;  %s1328_s25 = sphi %s1382_s25, %s1490_s25   ;;  %v1324_v4 = vphi %v1380_v4, %v1489_v4   ;;  %v1320_v3 = vphi %v1378_v3, %v1488_v3  }
  0x12   : >> { %1209 = vmatprep.subr.mxu1 %v1140_v5  ;;  %1214 = vmatprep.subr.mxu0 %v211_v6  ;;  %v1145_v8 = vld [vmem:[%s1485_s1 + $0x20] sm:$0xff]  ;;  %p220_p6 = scmp.gt.s32.totalorder %s1328_s25, 0  ;;  %p1133_p7 = scmp.lt.s32.totalorder %s1328_s25, 15  ;;  %v1131_v14 = vld [vmem:[%s1485_s1 + $0x8] sm:$0xff]  ;;  %v1165_v20 = vld [vmem:[%s1485_s1 + $0x38] sm:$0xff]  ;;  %vm967_vm1 = vcmp.lt.s32.totalorder %v1358_v1, 1 }
  0x13   : >> { %1210 = vmatpush3.msra.mxu1 %v1140_v5  ;;  %1215 = vmatpush3.msra.mxu0 %v211_v6  ;;  %p218_p8 = pnand %p217_p5, %p216_p4  ;;  %s193_s7 = sadd.s32 4294967295, %s1328_s25  ;;  %v1132_v21 = vld [vmem:[%s1485_s1 + $0x10] sm:$0xff]  ;;  %v1168_v27 = vld [vmem:[%s1485_s1 + $0x40] sm:$0xff]  ;;  %vm963_vm2 = vcmp.ge.s32.totalorder %v1358_v1, 1  ;;  %vm976_vm3 = vcmp.lt.s32.totalorder %v1358_v1, 7  ;;  %vm973_vm4 = vcmp.le.s32.totalorder %v1361_v2, 14 }
  0x14   : >> { %1229 = vmatprep.subr.mxu0 %v1402_v7  ;;  %1219 = vmatprep.subr.mxu1 %v1145_v8  ;;  %s221_s8 = scalar_select %p220_p6, %s1328_s25, 0  ;;  %v1162_v22 = vld [vmem:[%s1485_s1 + $0x30] sm:$0xff] }
  0x15   : >> { %s1139_s9 = scalar_select %p218_p8, 0, 1 }
  0x16   : >> { %s1494_s8 = smov (!%p1133_p7, %s221_s8), 15  ;;  %p194_p9 = scmp.ge.s32.totalorder %s193_s7, 0 }
  0x17   : >> { %s229_s10 = scvt.s32.f32 %s1139_s9  ;;  %s1138_s11 = sshll.u32 %s1494_s8, 4 }
  0x18   : >> { %p195_p10 = scmp.le.s32.totalorder %s193_s7, 15  ;;  %s225_s13 = scalar_lea.vmem %s1366_s18, %s1138_s11 }
  0x19   : >> { %v230_v9 = vstv %s229_s10  ;;  %p198_p11 = scmp.gt.s32.totalorder %s193_s7, 0  ;;  %v226_v10 = vld [vmem:[%s225_s13] sm:$0xff]  ;;  %v227_v11 = vld [vmem:[%s225_s13 + $0x8] sm:$0xff]  ;;  %p1124_p13 = scmp.lt.s32.totalorder %s193_s7, 15 }
  0x1a   : >> { %p196_p12 = pnand %p195_p10, %p194_p9  ;;  %v231_v12 = vmul.f32 %v230_v9, %v226_v10  ;;  %v232_v13 = vmul.f32 %v230_v9, %v227_v11  ;;  %s1421_s19 = sadd.s32 1, %s1328_s25  }
  0x1b   : >> { %s1496_s7 = smov (!%p198_p11, %s193_s7), 0  ;;  %p703_p0 = scmp.ge.s32.totalorder %s1421_s19, 0 }
  0x1c   : >> { %s1130_s14 = scalar_select %p196_p12, 0, 1  ;;  %1211 = vmatprep.mubr.msk.f32.mxu1 %vm235_vm0, %v231_v12 }
  0x1d   : >> { %s1498_s7 = smov (!%p1124_p13, %s1496_s7), 15  ;;  %1212 = vmatmul.mubr.msk.f32.vlgmr.msra.gmra.mrb[0].mxu1 %vm235_vm0, %v232_v13  ;;  %p704_p1 = scmp.le.s32.totalorder %s1421_s19, 15 }
  0x1e   : >> { %s207_s17 = scvt.s32.f32 %s1130_s14  ;;  %s1129_s20 = sshll.u32 %s1498_s7, 4  ;;  %1220 = vmatpush3.msra.mxu1 %v1145_v8  ;;  %1221 = vmatprep.mubr.msk.f32.mxu1 %vm235_vm0, %v231_v12 }
  0x1f   : >> { %s203_s22 = scalar_lea.vmem %s1366_s18, %s1129_s20  ;;  %1224 = vmatprep.subr.mxu1 %v1131_v14  ;;  %p707_p2 = scmp.gt.s32.totalorder %s1421_s19, 0 }
  0x20   : >> { %v208_v15 = vstv %s207_s17  ;;  %v204_v16 = vld [vmem:[%s203_s22] sm:$0xff]  ;;  %v205_v17 = vld [vmem:[%s203_s22 + $0x8] sm:$0xff]  ;;  %p1155_p3 = scmp.lt.s32.totalorder %s1421_s19, 15  ;;  %p705_p4 = pnand %p704_p1, %p703_p0 }
  0x21   : >> { %v209_v18 = vmul.f32 %v208_v15, %v204_v16  ;;  %v210_v19 = vmul.f32 %v208_v15, %v205_v17  ;;  %1222 = vmatmul.mubr.msk.f32.vlgmr.msra.gmra.mrb[2].mxu1 %vm235_vm0, %v232_v13  ;;  %s708_s27 = scalar_select %p707_p2, %s1421_s19, 0 }
  0x22   : >> { %1225 = vmatpush3.msra.mxu1 %v1131_v14  ;;  %s1161_s30 = scalar_select %p705_p4, 0, 1 }
  0x23   : >> { %1216 = vmatprep.mubr.msk.f32.mxu0 %vm235_vm0, %v209_v18  ;;  %1226 = vmatprep.mubr.msk.f32.mxu1 %vm235_vm0, %v209_v18  ;;  %s1500_s27 = smov (!%p1155_p3, %s708_s27), 15  ;;  %s1171_s11 = sshll.u32 %s1328_s25, 4 }
  0x24   : >> { %1217 = vmatmul.mubr.msk.f32.vlgmr.msra.gmra.mrb[0].mxu0 %vm235_vm0, %v210_v19  ;;  %1244 = vmatprep.subr.mxu1 %v1165_v20  ;;  %s716_s4 = scvt.s32.f32 %s1161_s30  ;;  %s1160_s5 = sshll.u32 %s1500_s27, 4 }
  0x25   : >> { %1230 = vmatpush3.msra.mxu0 %v1402_v7  ;;  %1231 = vmatprep.mubr.msk.f32.mxu0 %vm235_vm0, %v231_v12  ;;  %s712_s8 = scalar_lea.vmem %s1366_s18, %s1160_s5  ;;  %s986_s13 = scalar_lea.vmem %s1371_s21, %s1171_s11 }
  0x26   : >> { %1234 = vmatprep.subr.mxu0 %v1132_v21  ;;  %v717_v23 = vstv %s716_s4  ;;  %v713_v24 = vld [vmem:[%s712_s8] sm:$0xff]  ;;  %v714_v26 = vld [vmem:[%s712_s8 + $0x8] sm:$0xff]  ;;  %p187_p5 = scmp.ge.s32.totalorder %s1421_s19, 16   ;;  %s1490_s25 = smov %s1421_s19 }
  0x27   : >> { %v718_v25 = vmul.f32 %v717_v23, %v713_v24  ;;  %v719_v28 = vmul.f32 %v717_v23, %v714_v26 }
  0x28   : >> { %1232 = vmatmul.mubr.msk.f32.vlgmr.msra.gmra.mrb[2].mxu0 %vm235_vm0, %v232_v13 }
  0x29   : >> { %1235 = vmatpush3.msra.mxu0 %v1132_v21  ;;  %1227 = vmatmul.mubr.msk.f32.vlgmr.msra.gmra.mrb[2].mxu1 %vm235_vm0, %v210_v19 }
  0x2a   : >> { %1236 = vmatprep.mubr.msk.f32.mxu0 %vm235_vm0, %v209_v18  ;;  %1239 = vmatprep.subr.mxu0 %v1162_v22 }
  0x2b   : >> { %1245 = vmatpush3.msra.mxu1 %v1165_v20  ;;  %1246 = vmatprep.mubr.msk.f32.mxu1 %vm235_vm0, %v718_v25 }
  0x30   : >> { %1237 = vmatmul.mubr.msk.f32.vlgmr.msra.gmra.mrb[2].mxu0 %vm235_vm0, %v210_v19 }
  0x31   : >> { %1240 = vmatpush3.msra.mxu0 %v1162_v22  ;;  %1241 = vmatprep.mubr.msk.f32.mxu0 %vm235_vm0, %v718_v25 }
  0x32   : >> { %1249 = vmatprep.subr.mxu0 %v1168_v27  ;;  %1247 = vmatmul.mubr.msk.f32.vlgmr.msra.gmra.mrb[2].mxu1 %vm235_vm0, %v719_v28 }
  0x34   : >> { %1242 = vmatmul.mubr.msk.f32.vlgmr.msra.gmra.mrb[0].mxu0 %vm235_vm0, %v719_v28 }
  0x35   : >> { %1250 = vmatpush3.msra.mxu0 %v1168_v27  ;;  %1251 = vmatprep.mubr.msk.f32.mxu0 %vm235_vm0, %v718_v25 }
  0x38   : >> { %1252 = vmatmul.mubr.msk.f32.vlgmr.msra.gmra.mrb[2].mxu0 %vm235_vm0, %v719_v28 }
  0xf0   : >> { %v1213_v29 = vpop.f32.mrb[0].mxu1 }
  0xf1   : >> { %v308_v30 = vpop.f32.mrb[1].mxu1 }
 0x105   : >> { %v1248_v31 = vpop.f32.mrb[2].mxu1 }
 0x106   : >> { %v873_v32 = vpop.f32.mrb[3].mxu1 }
 0x107   : >> { %v1243_v33 = vpop.f32.mrb[0].mxu0 }
 0x108   : >> { %v1254_v34 = vadd.f32 %v1243_v33, %v1213_v29  ;;  %v794_v35 = vpop.f32.mrb[1].mxu0 }
 0x109   : >> { %v1255_v36 = vadd.f32 %v794_v35, %v308_v30 }
 0x10a   : >> { %v966_v37 = vrot.slane %v1254_v34, 7 }
 0x10b   : >> { %v965_v38 = vrot.slane %v1255_v36, 7  ;;  %v1253_v39 = vpop.f32.mrb[2].mxu0 }
 0x10c   : >> { %v975_v40 = vrot.slane %v1253_v39, 1  ;;  %v952_v41 = vpop.f32.mrb[3].mxu0 }
 0x10d   : >> { %v968_v42 = vsel %vm967_vm1, %v965_v38, %v966_v37  ;;  %v969_v43 = vsel %vm967_vm1, %v966_v37, %v965_v38  ;;  %v974_v44 = vrot.slane %v952_v41, 1 }
 0x10e   : >> { %v982_v45 = vadd.f32 %v1248_v31, %v968_v42  ;;  %v970_v46 = vsel %vm963_vm2, %v969_v43, 0.0 }
 0x10f   : >> { %v981_v47 = vadd.f32 %v970_v46, %v873_v32  ;;  %v977_v48 = vsel %vm976_vm3, %v974_v44, %v975_v40  ;;  %v978_v49 = vsel %vm976_vm3, %v975_v40, %v974_v44 }
 0x110   : >> { %v980_v50 = vsel %vm973_vm4, %v978_v49, 0.0 }
 0x111   : >> { %v983_v51 = vadd.f32 %v981_v47, %v977_v48  ;;  %v984_v52 = vadd.f32 %v982_v45, %v980_v50 }
 0x113   : >> { %987 = vst [vmem:[%s986_s13] sm:$0xff] %v983_v51  ;;  %988 = vst [vmem:[%s986_s13 + $0x8] sm:$0xff] %v984_v52  ;;  %v989_v53 = vadd.f32 %v984_v52, %v983_v51  ;;  %v997_v54 = vmul.f32 %v983_v51, %v983_v51  ;;  %v998_v55 = vmul.f32 %v984_v52, %v984_v52 }
 0x115   : >> { %v990_v56 = vrot.slane %v989_v53, 4  ;;  %v999_v57 = vadd.f32 %v998_v55, %v997_v54 }
 0x117   : >> { %v991_v58 = vadd.f32 %v990_v56, %v989_v53  ;;  %v1000_v59 = vrot.slane %v999_v57, 4 }
 0x119   : >> { %v992_v60 = vrot.slane %v991_v58, 2  ;;  %v1001_v61 = vadd.f32 %v1000_v59, %v999_v57 }
 0x11b   : >> { %v993_v62 = vadd.f32 %v992_v60, %v991_v58  ;;  %v1002_v63 = vrot.slane %v1001_v61, 2 }
 0x11d   : >> { %v994_v0 = vrot.slane %v993_v62, 1  ;;  %v1003_v5 = vadd.f32 %v1002_v63, %v1001_v61 }
 0x11f   : >> { %v995_v6 = vadd.f32 %v994_v0, %v993_v62  ;;  %v1004_v7 = vrot.slane %v1003_v5, 1  ;;  %189 = sbr.rel (!%p187_p5) target bundleno = 17 (0x11), region = 89 }
 0x121   : >> { %v996_v8 = vadd.f32 %v1324_v4, %v995_v6   ;;  %v1005_v9 = vadd.f32 %v1004_v7, %v1003_v5 }
 0x123   : >> { %v1006_v10 = vadd.f32 %v1320_v3, %v1005_v9   ;;  %v1489_v4 = vmov %v996_v8  ;;  %1007 = vst [vmem:[%s1376_s24] sm:$0x1] (%p187_p5), %v996_v8 }
 0x125   : >> { %v1488_v3 = vmov %v1006_v10  ;;  %1008 = vst [vmem:[%s1376_s24 + $0x1] sm:$0x1] (%p187_p5), %v1006_v10 }
 0x126 PF: > { %s14_s12 = sadd.s32 1, %s1316_s12  }
 0x127   : > { %p11_p6 = scmp.ge.s32.totalorder %s14_s12, 4  }
 0x129   :  { %13 = sbr.rel (!%p11_p6) target bundleno = 1 (0x1), region = 100 }

// kernel: decoder_block_forward.8
= control target key start
LH: loop header
LB: loop body
LE: loop exit
PB: predicated region body
PF: predicated region fallthrough
CT: control target
= control target key end

     0   :  { %s2261_s12 = smov 0   ;;  %s2865_s0 = inlined_call_operand.vmem [shape: f32[2,16,16,128], index: 0, kind: input, shape index: {}]   ;;  %s2866_s1 = inlined_call_operand.vmem [shape: f32[9,128,128], index: 1, kind: input, shape index: {}]   ;;  %s2867_s2 = inlined_call_operand.vmem [shape: f32[2,16,16,128], index: 2, kind: output, shape index: {0}]   ;;  %s2868_s3 = inlined_call_operand.vmem [shape: f32[2,2,128], index: 3, kind: output, shape index: {1}]  }
   0x1 LB: > { %s1230_s13 = sadd.s32 4294967295, %s2227_s12   ;;  %p1234_p0 = scmp.ge.s32.totalorder %s2227_s12, 1  ;;  %s2227_s12 = sphi %s2261_s12, %s14_s12  }
   0x2   : > { %p140_p1 = scmp.lt.s32.totalorder %s2227_s12, 3 }
   0x4   : > { %p141_p2 = pnand %p1234_p0, %p140_p1 }
   0x5   : > { %p168_p3 = scmp.lt.s32.totalorder (!%p141_p2), %s1230_s13, 1  ;;  %v182_v0 = vlaneseq (!%p141_p2)  ;;  %v2289_v3 = vmov (!%p141_p2), 0.0   ;;  %v2291_v4 = vmov (!%p141_p2), 0.0   ;;  %s2293_s25 = smov (!%p141_p2), 0  }
   0x6   : > { %144 = sbr.rel (%p141_p2) target bundleno = 419 (0x1a3), region = 28 }
   0x7   : > { %v2269_v1 = vshrl.u32 (!%p141_p2), %v182_v0, 7 }
   0x9   : > { %v2272_v2 = vadd.s32 (!%p141_p2), 8, %v2269_v1 }
   0xd   : > { %s2876_s13 = smov (!%p168_p3, %s1230_s13), 1 }
   0xe   : > { %s1392_s14 = sshll.u32 %s2876_s13, 8  ;;  %s1239_s15 = sshll.u32 %s2876_s13, 1 }
   0xf   : > { %s2277_s18 = scalar_lea.vmem %s2865_s0, %s1392_s14  ;;  %s2282_s21 = scalar_lea.vmem %s2867_s2, %s1392_s14 }
  0x10   : > { %s2287_s24 = scalar_lea.vmem %s2868_s3, %s1239_s15 }
  0x11 LB: >> { %v1286_v5 = vld [vmem:[%s2866_s1 + $0x180] sm:$0xff]  ;;  %v1287_v6 = vld [vmem:[%s2866_s1 + $0x188] sm:$0xff]  ;;  %v1288_v10 = vld [vmem:[%s2866_s1 + $0x190] sm:$0xff]  ;;  %p261_p4 = scmp.ge.s32.totalorder %s2239_s25, 0  ;;  %p262_p5 = scmp.le.s32.totalorder %s2239_s25, 15  ;;  %vm1083_vm0 = vcmp.lt.s32.totalorder %v2269_v1, 1  ;;  %s2239_s25 = sphi %s2293_s25, %s2874_s25   ;;  %v2235_v4 = vphi %v2291_v4, %v2873_v4   ;;  %v2231_v3 = vphi %v2289_v3, %v2872_v3  }
  0x12   : >> { %v211_v7 = vld [vmem:[%s2866_s1] sm:$0xff]  ;;  %v1877_v8 = vpack.c.bf16 %v1287_v6, %v1286_v5  ;;  %v212_v9 = vld [vmem:[%s2866_s1 + $0x8] sm:$0xff]  ;;  %v1289_v11 = vld [vmem:[%s2866_s1 + $0x198] sm:$0xff]  ;;  %p265_p6 = scmp.gt.s32.totalorder %s2239_s25, 0  ;;  %p1279_p7 = scmp.lt.s32.totalorder %s2239_s25, 15  ;;  %vm1079_vm1 = vcmp.ge.s32.totalorder %v2269_v1, 1 }
  0x13   : >> { %v1909_v12 = vpack.c.bf16 %v212_v9, %v211_v7  ;;  %v1881_v13 = vpack.c.bf16 %v1289_v11, %v1288_v10  ;;  %v213_v14 = vld [vmem:[%s2866_s1 + $0x10] sm:$0xff]  ;;  %v214_v15 = vld [vmem:[%s2866_s1 + $0x18] sm:$0xff]  ;;  %v1290_v16 = vld [vmem:[%s2866_s1 + $0x1a0] sm:$0xff]  ;;  %p2344_p8 = pnand %p262_p5, %p261_p4  ;;  %s2349_s29 = sadd.s32 4294967295, %s2239_s25  ;;  %vm1092_vm2 = vcmp.lt.s32.totalorder %v2269_v1, 7  ;;  %vm1089_vm3 = vcmp.le.s32.totalorder %v2272_v2, 14 }
  0x14   : >> { %1878 = vmatprep.subr.bf16.mxu1 %v1877_v8  ;;  %v1913_v17 = vpack.c.bf16 %v214_v15, %v213_v14  ;;  %v1291_v18 = vld [vmem:[%s2866_s1 + $0x1a8] sm:$0xff]  ;;  %v215_v19 = vld [vmem:[%s2866_s1 + $0x20] sm:$0xff]  ;;  %s266_s30 = scalar_select %p265_p6, %s2239_s25, 0  ;;  %v1292_v23 = vld [vmem:[%s2866_s1 + $0x1b0] sm:$0xff] }
  0x15   : >> { %v216_v20 = vld [vmem:[%s2866_s1 + $0x28] sm:$0xff]  ;;  %1910 = vmatprep.subr.bf16.mxu0 %v1909_v12  ;;  %1880 = vmatpush3.bf16.msra.mxu1 %v1877_v8  ;;  %v1885_v21 = vpack.c.bf16 %v1291_v18, %v1290_v16  ;;  %v1293_v24 = vld [vmem:[%s2866_s1 + $0x1b8] sm:$0xff]  ;;  %s1285_s8 = scalar_select %p2344_p8, 0, 1  ;;  %v217_v25 = vld [vmem:[%s2866_s1 + $0x30] sm:$0xff] }
  0x16   : >> { %1912 = vmatpush3.bf16.msra.mxu0 %v1909_v12  ;;  %1882 = vmatprep.subr.bf16.mxu1 %v1881_v13  ;;  %v1917_v22 = vpack.c.bf16 %v216_v20, %v215_v19  ;;  %v218_v26 = vld [vmem:[%s2866_s1 + $0x38] sm:$0xff]  ;;  %s2878_s30 = smov (!%p1279_p7, %s266_s30), 15  ;;  %p194_p9 = scmp.ge.s32.totalorder %s2349_s29, 0  ;;  %v1889_v27 = vpack.c.bf16 %v1293_v24, %v1292_v23  ;;  %v1294_v29 = vld [vmem:[%s2866_s1 + $0x1c0] sm:$0xff]  ;;  %v1295_v30 = vld [vmem:[%s2866_s1 + $0x1c8] sm:$0xff] }
  0x17   : >> { %1914 = vmatprep.subr.bf16.mxu0 %v1913_v17  ;;  %s2368_s14 = scvt.s32.f32 %s1285_s8  ;;  %s1284_s15 = sshll.u32 %s2878_s30, 4  ;;  %v1921_v28 = vpack.c.bf16 %v218_v26, %v217_v25  ;;  %v219_v32 = vld [vmem:[%s2866_s1 + $0x40] sm:$0xff]  ;;  %v220_v33 = vld [vmem:[%s2866_s1 + $0x48] sm:$0xff]  ;;  %v1893_v36 = vpack.c.bf16 %v1295_v30, %v1294_v29  ;;  %v1296_v38 = vld [vmem:[%s2866_s1 + $0x1d0] sm:$0xff] }
  0x18   : >> { %p195_p10 = scmp.le.s32.totalorder %s2349_s29, 15  ;;  %s2379_s22 = scalar_lea.vmem %s2277_s18, %s1284_s15  ;;  %v1925_v37 = vpack.c.bf16 %v220_v33, %v219_v32  ;;  %v1297_v39 = vld [vmem:[%s2866_s1 + $0x1d8] sm:$0xff]  ;;  %v221_v40 = vld [vmem:[%s2866_s1 + $0x50] sm:$0xff]  ;;  %v1298_v45 = vld [vmem:[%s2866_s1 + $0x1e0] sm:$0xff] }
  0x19   : >> { %1884 = vmatpush3.bf16.msra.mxu1 %v1881_v13  ;;  %v275_v31 = vstv %s2368_s14  ;;  %p198_p11 = scmp.gt.s32.totalorder %s2349_s29, 0  ;;  %v271_v34 = vld [vmem:[%s2379_s22] sm:$0xff]  ;;  %p1240_p13 = scmp.lt.s32.totalorder %s2349_s29, 15  ;;  %v222_v41 = vld [vmem:[%s2866_s1 + $0x58] sm:$0xff]  ;;  %v1897_v42 = vpack.c.bf16 %v1297_v39, %v1296_v38  ;;  %v1299_v46 = vld [vmem:[%s2866_s1 + $0x1e8] sm:$0xff] }
  0x1a   : >> { %1916 = vmatpush3.bf16.msra.mxu0 %v1913_v17  ;;  %1886 = vmatprep.subr.bf16.mxu1 %v1885_v21  ;;  %p2392_p12 = pnand %p195_p10, %p194_p9  ;;  %v2399_v35 = vmul.f32 %v275_v31, %v271_v34  ;;  %v1929_v44 = vpack.c.bf16 %v222_v41, %v221_v40  ;;  %v223_v48 = vld [vmem:[%s2866_s1 + $0x60] sm:$0xff]  ;;  %v224_v49 = vld [vmem:[%s2866_s1 + $0x68] sm:$0xff]  ;;  %v1901_v51 = vpack.c.bf16 %v1299_v46, %v1298_v45  ;;  %v1300_v53 = vld [vmem:[%s2866_s1 + $0x1f0] sm:$0xff]  ;;  %s2618_s5 = sadd.s32 1, %s2239_s25  }
  0x1b   : >> { %1918 = vmatprep.subr.bf16.mxu0 %v1917_v22  ;;  %s2880_s29 = smov (!%p198_p11, %s2349_s29), 0  ;;  %v1933_v52 = vpack.c.bf16 %v224_v49, %v223_v48  ;;  %v1301_v54 = vld [vmem:[%s2866_s1 + $0x1f8] sm:$0xff]  ;;  %v225_v55 = vld [vmem:[%s2866_s1 + $0x70] sm:$0xff]  ;;  %v1302_v59 = vld [vmem:[%s2866_s1 + $0x200] sm:$0xff]  ;;  %p784_p0 = scmp.gt.s32.totalorder %s2618_s5, 0 }
  0x1c   : >> { %s1246_s4 = scalar_select %p2392_p12, 0, 1  ;;  %1594 = vmatprep.mubr.f32.mxu1 %v2399_v35  ;;  %v226_v56 = vld [vmem:[%s2866_s1 + $0x78] sm:$0xff]  ;;  %v1905_v57 = vpack.c.bf16 %v1301_v54, %v1300_v53  ;;  %v1303_v60 = vld [vmem:[%s2866_s1 + $0x208] sm:$0xff]  ;;  %v1318_v61 = vld [vmem:[%s2866_s1 + $0x280] sm:$0xff] }
  0x1d   : >> { %1888 = vmatpush3.bf16.msra.mxu1 %v1885_v21  ;;  %s2882_s29 = smov (!%p1240_p13, %s2880_s29), 15  ;;  %v1937_v58 = vpack.c.bf16 %v226_v56, %v225_v55  ;;  %v1319_v62 = vld [vmem:[%s2866_s1 + $0x288] sm:$0xff]  ;;  %v1941_v0 = vpack.c.bf16 %v1303_v60, %v1302_v59  ;;  %v1304_v7 = vld [vmem:[%s2866_s1 + $0x210] sm:$0xff]  ;;  %v1305_v8 = vld [vmem:[%s2866_s1 + $0x218] sm:$0xff]  ;;  %p780_p1 = scmp.ge.s32.totalorder %s2618_s5, 0 }
  0x1e   : >> { %1920 = vmatpush3.bf16.msra.mxu0 %v1917_v22  ;;  %1890 = vmatprep.subr.bf16.mxu1 %v1889_v27  ;;  %s2417_s15 = scvt.s32.f32 %s1246_s4  ;;  %s1245_s16 = sshll.u32 %s2882_s29, 4  ;;  %v272_v63 = vld [vmem:[%s2379_s22 + $0x8] sm:$0xff]  ;;  %v2005_v6 = vpack.c.bf16 %v1319_v62, %v1318_v61  ;;  %v1320_v10 = vld [vmem:[%s2866_s1 + $0x290] sm:$0xff]  ;;  %v1321_v11 = vld [vmem:[%s2866_s1 + $0x298] sm:$0xff]  ;;  %v1945_v13 = vpack.c.bf16 %v1305_v8, %v1304_v7 }
  0x1f   : >> { %1922 = vmatprep.subr.bf16.mxu0 %v1921_v28  ;;  %s2420_s17 = scalar_lea.vmem %s2277_s18, %s1245_s16  ;;  %v2473_v9 = vmul.f32 %v275_v31, %v272_v63  ;;  %v2009_v14 = vpack.c.bf16 %v1321_v11, %v1320_v10  ;;  %v1306_v15 = vld [vmem:[%s2866_s1 + $0x220] sm:$0xff]  ;;  %v1307_v16 = vld [vmem:[%s2866_s1 + $0x228] sm:$0xff]  ;;  %v1308_v21 = vld [vmem:[%s2866_s1 + $0x230] sm:$0xff]  ;;  %p781_p2 = scmp.le.s32.totalorder %s2618_s5, 15 }
  0x20   : >> { %v208_v43 = vstv %s2417_s15  ;;  %v204_v47 = vld [vmem:[%s2420_s17] sm:$0xff]  ;;  %v205_v5 = vld [vmem:[%s2420_s17 + $0x8] sm:$0xff]  ;;  %v1949_v19 = vpack.c.bf16 %v1307_v16, %v1306_v15  ;;  %v1309_v22 = vld [vmem:[%s2866_s1 + $0x238] sm:$0xff]  ;;  %p1334_p3 = scmp.lt.s32.totalorder %s2618_s5, 15  ;;  %p187_p5 = scmp.ge.s32.totalorder %s2618_s5, 16  }
  0x21   : >> { %1892 = vmatpush3.bf16.msra.mxu1 %v1889_v27  ;;  %v2436_v50 = vmul.f32 %v208_v43, %v204_v47  ;;  %v2481_v12 = vmul.f32 %v208_v43, %v205_v5  ;;  %v1322_v17 = vld [vmem:[%s2866_s1 + $0x2a0] sm:$0xff]  ;;  %v1323_v18 = vld [vmem:[%s2866_s1 + $0x2a8] sm:$0xff]  ;;  %v1324_v23 = vld [vmem:[%s2866_s1 + $0x2b0] sm:$0xff]  ;;  %v1953_v25 = vpack.c.bf16 %v1309_v22, %v1308_v21  ;;  %s785_s19 = scalar_select %p784_p0, %s2618_s5, 0 }
  0x22   : >> { %1924 = vmatpush3.bf16.msra.mxu0 %v1921_v28  ;;  %1894 = vmatprep.subr.bf16.mxu1 %v1893_v36  ;;  %v2013_v20 = vpack.c.bf16 %v1323_v18, %v1322_v17  ;;  %v1325_v24 = vld [vmem:[%s2866_s1 + $0x2b8] sm:$0xff]  ;;  %v1310_v27 = vld [vmem:[%s2866_s1 + $0x240] sm:$0xff]  ;;  %v1311_v28 = vld [vmem:[%s2866_s1 + $0x248] sm:$0xff]  ;;  %p2661_p4 = pnand %p781_p2, %p780_p1 }
  0x23   : >> { %1926 = vmatprep.subr.bf16.mxu0 %v1925_v37  ;;  %1629 = vmatprep.mubr.f32.mxu0 %v2436_v50  ;;  %v2017_v26 = vpack.c.bf16 %v1325_v24, %v1324_v23  ;;  %v1326_v29 = vld [vmem:[%s2866_s1 + $0x2c0] sm:$0xff]  ;;  %v1327_v30 = vld [vmem:[%s2866_s1 + $0x2c8] sm:$0xff]  ;;  %v1957_v31 = vpack.c.bf16 %v1311_v28, %v1310_v27  ;;  %v1312_v33 = vld [vmem:[%s2866_s1 + $0x250] sm:$0xff]  ;;  %s2884_s19 = smov (!%p1334_p3, %s785_s19), 15 }
  0x24   : >> { %v2021_v32 = vpack.c.bf16 %v1327_v30, %v1326_v29  ;;  %v1313_v34 = vld [vmem:[%s2866_s1 + $0x258] sm:$0xff]  ;;  %v1314_v39 = vld [vmem:[%s2866_s1 + $0x260] sm:$0xff]  ;;  %v1315_v40 = vld [vmem:[%s2866_s1 + $0x268] sm:$0xff]  ;;  %s1340_s13 = scalar_select %p2661_p4, 0, 1 }
  0x25   : >> { %1896 = vmatpush3.bf16.msra.mxu1 %v1893_v36  ;;  %v1329_v36 = vld [vmem:[%s2866_s1 + $0x2d8] sm:$0xff]  ;;  %v1330_v41 = vld [vmem:[%s2866_s1 + $0x2e0] sm:$0xff]  ;;  %v1965_v43 = vpack.c.bf16 %v1315_v40, %v1314_v39  ;;  %v1316_v45 = vld [vmem:[%s2866_s1 + $0x270] sm:$0xff]  ;;  %s1339_s15 = sshll.u32 %s2884_s19, 4 }
  0x26   : >> { %1928 = vmatpush3.bf16.msra.mxu0 %v1925_v37  ;;  %1898 = vmatprep.subr.bf16.mxu1 %v1897_v42  ;;  %v1961_v37 = vpack.c.bf16 %v1313_v34, %v1312_v33  ;;  %v1317_v46 = vld [vmem:[%s2866_s1 + $0x278] sm:$0xff]  ;;  %v1332_v47 = vld [vmem:[%s2866_s1 + $0x2f0] sm:$0xff]  ;;  %v1248_v53 = vld [vmem:[%s2866_s1 + $0x88] sm:$0xff]  ;;  %s2693_s4 = scvt.s32.f32 %s1340_s13  ;;  %s2696_s19 = scalar_lea.vmem %s2277_s18, %s1339_s15 }
  0x27   : >> { %1930 = vmatprep.subr.bf16.mxu0 %v1929_v44  ;;  %v1333_v48 = vld [vmem:[%s2866_s1 + $0x2f8] sm:$0xff]  ;;  %v1969_v49 = vpack.c.bf16 %v1317_v46, %v1316_v45  ;;  %v1263_v54 = vld [vmem:[%s2866_s1 + $0x100] sm:$0xff]  ;;  %v1264_v55 = vld [vmem:[%s2866_s1 + $0x108] sm:$0xff] }
  0x28   : >> { %v1250_v59 = vld [vmem:[%s2866_s1 + $0x98] sm:$0xff]  ;;  %v1265_v60 = vld [vmem:[%s2866_s1 + $0x110] sm:$0xff]  ;;  %v1252_v5 = vld [vmem:[%s2866_s1 + $0xa8] sm:$0xff] }
  0x29   : >> { %1900 = vmatpush3.bf16.msra.mxu1 %v1897_v42  ;;  %v1331_v42 = vld [vmem:[%s2866_s1 + $0x2e8] sm:$0xff]  ;;  %v1266_v61 = vld [vmem:[%s2866_s1 + $0x118] sm:$0xff]  ;;  %v1253_v11 = vld [vmem:[%s2866_s1 + $0xb0] sm:$0xff] }
  0x2a   : >> { %1932 = vmatpush3.bf16.msra.mxu0 %v1929_v44  ;;  %1902 = vmatprep.subr.bf16.mxu1 %v1901_v51  ;;  %v2029_v44 = vpack.c.bf16 %v1331_v42, %v1330_v41  ;;  %v2041_v63 = vpack.c.bf16 %v1266_v61, %v1265_v60  ;;  %v1268_v7 = vld [vmem:[%s2866_s1 + $0x128] sm:$0xff]  ;;  %v1255_v17 = vld [vmem:[%s2866_s1 + $0xc0] sm:$0xff]  ;;  %v1257_v22 = vld [vmem:[%s2866_s1 + $0xd0] sm:$0xff] }
  0x2b   : >> { %1934 = vmatprep.subr.bf16.mxu0 %v1933_v52  ;;  %v1256_v18 = vld [vmem:[%s2866_s1 + $0xc8] sm:$0xff]  ;;  %v1258_v23 = vld [vmem:[%s2866_s1 + $0xd8] sm:$0xff]  ;;  %v1273_v24 = vld [vmem:[%s2866_s1 + $0x150] sm:$0xff] }
  0x2c   : >> { %v1259_v28 = vld [vmem:[%s2866_s1 + $0xe0] sm:$0xff]  ;;  %v1260_v29 = vld [vmem:[%s2866_s1 + $0xe8] sm:$0xff]  ;;  %v1261_v34 = vld [vmem:[%s2866_s1 + $0xf0] sm:$0xff] }
  0x2d   : >> { %1904 = vmatpush3.bf16.msra.mxu1 %v1901_v51  ;;  %v2033_v51 = vpack.c.bf16 %v1333_v48, %v1332_v47  ;;  %v1275_v30 = vld [vmem:[%s2866_s1 + $0x160] sm:$0xff]  ;;  %v1358_v41 = vld [vmem:[%s2866_s1 + $0x388] sm:$0xff]  ;;  %v1359_v46 = vld [vmem:[%s2866_s1 + $0x390] sm:$0xff] }
  0x2e   : >> { %1936 = vmatpush3.bf16.msra.mxu0 %v1933_v52  ;;  %1906 = vmatprep.subr.bf16.mxu1 %v1905_v57  ;;  %v1247_v52 = vld [vmem:[%s2866_s1 + $0x80] sm:$0xff]  ;;  %v1360_v47 = vld [vmem:[%s2866_s1 + $0x398] sm:$0xff]  ;;  %v1343_v48 = vld [vmem:[%s2866_s1 + $0x310] sm:$0xff] }
  0x2f   : >> { %1938 = vmatprep.subr.bf16.mxu0 %v1937_v58  ;;  %v1973_v56 = vpack.c.bf16 %v1248_v53, %v1247_v52  ;;  %v1357_v40 = vld [vmem:[%s2866_s1 + $0x380] sm:$0xff]  ;;  %v794_v52 = vstv %s2693_s4  ;;  %v2105_v53 = vpack.c.bf16 %v1360_v47, %v1359_v46  ;;  %v1382_v46 = vld [vmem:[%s2866_s1 + $0x448] sm:$0xff]  ;;  %s1389_s4 = sshll.u32 %s2239_s25, 4  ;;  %s2874_s25 = smov %s2618_s5 }
  0x30   : >> { %v1341_v42 = vld [vmem:[%s2866_s1 + $0x300] sm:$0xff]  ;;  %s1102_s13 = scalar_lea.vmem %s2282_s21, %s1389_s4 }
  0x31   : >> { %1908 = vmatpush3.bf16.msra.mxu1 %v1905_v57  ;;  %v2037_v57 = vpack.c.bf16 %v1264_v55, %v1263_v54  ;;  %v1361_v55 = vld [vmem:[%s2866_s1 + $0x3a0] sm:$0xff] }
  0x32   : >> { %1940 = vmatpush3.bf16.msra.mxu0 %v1937_v58  ;;  %1942 = vmatprep.subr.bf16.mxu1 %v1941_v0  ;;  %v1249_v58 = vld [vmem:[%s2866_s1 + $0x90] sm:$0xff] }
  0x33   : >> { %2006 = vmatprep.subr.bf16.mxu0 %v2005_v6  ;;  %v1977_v62 = vpack.c.bf16 %v1250_v59, %v1249_v58  ;;  %v1345_v58 = vld [vmem:[%s2866_s1 + $0x320] sm:$0xff]  ;;  %v1346_v59 = vld [vmem:[%s2866_s1 + $0x328] sm:$0xff] }
  0x34   : >> { %1595 = vmatmul.mubr.f32.vlgmr.msra.gmra.mrb[0].mxu1 %v2473_v9  ;;  %v2077_v61 = vpack.c.bf16 %v1346_v59, %v1345_v58 }
  0x35   : >> { %1630 = vmatmul.mubr.f32.vlgmr.msra.gmra.mrb[0].mxu0 %v2481_v12  ;;  %1944 = vmatpush3.bf16.msra.mxu1 %v1941_v0  ;;  %v1251_v0 = vld [vmem:[%s2866_s1 + $0xa0] sm:$0xff] }
  0x36   : >> { %2008 = vmatpush3.bf16.msra.mxu0 %v2005_v6  ;;  %1946 = vmatprep.subr.bf16.mxu1 %v1945_v13  ;;  %v1267_v6 = vld [vmem:[%s2866_s1 + $0x120] sm:$0xff]  ;;  %v1981_v8 = vpack.c.bf16 %v1252_v5, %v1251_v0  ;;  %v1348_v0 = vld [vmem:[%s2866_s1 + $0x338] sm:$0xff] }
  0x37   : >> { %2010 = vmatprep.subr.bf16.mxu0 %v2009_v14  ;;  %1664 = vmatprep.mubr.f32.mxu1 %v2399_v35  ;;  %v2045_v10 = vpack.c.bf16 %v1268_v7, %v1267_v6  ;;  %v1365_v7 = vld [vmem:[%s2866_s1 + $0x3c0] sm:$0xff] }
  0x38   : >> { %1734 = vmatprep.mubr.f32.mxu0 %v2399_v35  ;;  %v1328_v35 = vld [vmem:[%s2866_s1 + $0x2d0] sm:$0xff] }
  0x39   : >> { %1948 = vmatpush3.bf16.msra.mxu1 %v1945_v13  ;;  %v2025_v38 = vpack.c.bf16 %v1329_v36, %v1328_v35  ;;  %v1254_v13 = vld [vmem:[%s2866_s1 + $0xb8] sm:$0xff]  ;;  %v1277_v36 = vld [vmem:[%s2866_s1 + $0x170] sm:$0xff] }
  0x3a   : >> { %2012 = vmatpush3.bf16.msra.mxu0 %v2009_v14  ;;  %1950 = vmatprep.subr.bf16.mxu1 %v1949_v19  ;;  %v1270_v14 = vld [vmem:[%s2866_s1 + $0x138] sm:$0xff]  ;;  %v1985_v15 = vpack.c.bf16 %v1254_v13, %v1253_v11  ;;  %v1350_v11 = vld [vmem:[%s2866_s1 + $0x348] sm:$0xff] }
  0x3b   : >> { %2014 = vmatprep.subr.bf16.mxu0 %v2013_v20  ;;  %v1262_v35 = vld [vmem:[%s2866_s1 + $0xf8] sm:$0xff] }
  0x3d   : >> { %1952 = vmatpush3.bf16.msra.mxu1 %v1949_v19  ;;  %v1272_v19 = vld [vmem:[%s2866_s1 + $0x148] sm:$0xff] }
  0x3e   : >> { %2016 = vmatpush3.bf16.msra.mxu0 %v2013_v20  ;;  %1954 = vmatprep.subr.bf16.mxu1 %v1953_v25  ;;  %v1989_v20 = vpack.c.bf16 %v1256_v18, %v1255_v17  ;;  %v1352_v17 = vld [vmem:[%s2866_s1 + $0x358] sm:$0xff] }
  0x3f   : >> { %2018 = vmatprep.subr.bf16.mxu0 %v2017_v26 }
  0x41   : >> { %1956 = vmatpush3.bf16.msra.mxu1 %v1953_v25  ;;  %v1274_v25 = vld [vmem:[%s2866_s1 + $0x158] sm:$0xff] }
  0x42   : >> { %2020 = vmatpush3.bf16.msra.mxu0 %v2017_v26  ;;  %1958 = vmatprep.subr.bf16.mxu1 %v1957_v31  ;;  %v1993_v26 = vpack.c.bf16 %v1258_v23, %v1257_v22  ;;  %v2057_v27 = vpack.c.bf16 %v1274_v25, %v1273_v24  ;;  %v1354_v22 = vld [vmem:[%s2866_s1 + $0x368] sm:$0xff]  ;;  %v1371_v25 = vld [vmem:[%s2866_s1 + $0x3f0] sm:$0xff] }
  0x43   : >> { %2022 = vmatprep.subr.bf16.mxu0 %v2021_v32 }
  0x45   : >> { %1960 = vmatpush3.bf16.msra.mxu1 %v1957_v31  ;;  %v1276_v31 = vld [vmem:[%s2866_s1 + $0x168] sm:$0xff] }
  0x46   : >> { %2024 = vmatpush3.bf16.msra.mxu0 %v2021_v32  ;;  %1962 = vmatprep.subr.bf16.mxu1 %v1961_v37  ;;  %v1997_v32 = vpack.c.bf16 %v1260_v29, %v1259_v28  ;;  %v2061_v33 = vpack.c.bf16 %v1276_v31, %v1275_v30  ;;  %v1356_v28 = vld [vmem:[%s2866_s1 + $0x378] sm:$0xff]  ;;  %v1373_v31 = vld [vmem:[%s2866_s1 + $0x400] sm:$0xff] }
  0x47   : >> { %2026 = vmatprep.subr.bf16.mxu0 %v2025_v38 }
  0x49   : >> { %1964 = vmatpush3.bf16.msra.mxu1 %v1961_v37  ;;  %v1278_v37 = vld [vmem:[%s2866_s1 + $0x178] sm:$0xff] }
  0x4a   : >> { %2028 = vmatpush3.bf16.msra.mxu0 %v2025_v38  ;;  %1966 = vmatprep.subr.bf16.mxu1 %v1965_v43  ;;  %v2001_v38 = vpack.c.bf16 %v1262_v35, %v1261_v34  ;;  %v2065_v39 = vpack.c.bf16 %v1278_v37, %v1277_v36  ;;  %v1375_v36 = vld [vmem:[%s2866_s1 + $0x410] sm:$0xff]  ;;  %v1376_v37 = vld [vmem:[%s2866_s1 + $0x418] sm:$0xff] }
  0x4b   : >> { %2030 = vmatprep.subr.bf16.mxu0 %v2029_v44 }
  0x4d   : >> { %1968 = vmatpush3.bf16.msra.mxu1 %v1965_v43  ;;  %v1342_v43 = vld [vmem:[%s2866_s1 + $0x308] sm:$0xff] }
  0x4e   : >> { %2032 = vmatpush3.bf16.msra.mxu0 %v2029_v44  ;;  %1970 = vmatprep.subr.bf16.mxu1 %v1969_v49  ;;  %v2101_v44 = vpack.c.bf16 %v1358_v41, %v1357_v40  ;;  %v2069_v45 = vpack.c.bf16 %v1342_v43, %v1341_v42  ;;  %v1378_v40 = vld [vmem:[%s2866_s1 + $0x428] sm:$0xff]  ;;  %v1379_v42 = vld [vmem:[%s2866_s1 + $0x430] sm:$0xff]  ;;  %v1380_v43 = vld [vmem:[%s2866_s1 + $0x438] sm:$0xff] }
  0x4f   : >> { %2034 = vmatprep.subr.bf16.mxu0 %v2033_v51 }
  0x51   : >> { %1972 = vmatpush3.bf16.msra.mxu1 %v1969_v49  ;;  %v1344_v49 = vld [vmem:[%s2866_s1 + $0x318] sm:$0xff] }
  0x52   : >> { %2036 = vmatpush3.bf16.msra.mxu0 %v2033_v51  ;;  %1974 = vmatprep.subr.bf16.mxu1 %v1973_v56  ;;  %v790_v51 = vld [vmem:[%s2696_s19] sm:$0xff]  ;;  %v2073_v54 = vpack.c.bf16 %v1344_v49, %v1343_v48  ;;  %v1383_v48 = vld [vmem:[%s2866_s1 + $0x450] sm:$0xff]  ;;  %v1384_v49 = vld [vmem:[%s2866_s1 + $0x458] sm:$0xff] }
  0x53   : >> { %2038 = vmatprep.subr.bf16.mxu0 %v2037_v57 }
  0x54   : >> { %1665 = vmatmul.mubr.f32.vlgmr.msra.gmra.mrb[2].mxu1 %v2473_v9 }
  0x55   : >> { %1976 = vmatpush3.bf16.msra.mxu1 %v1973_v56  ;;  %1735 = vmatmul.mubr.f32.vlgmr.msra.gmra.mrb[2].mxu0 %v2473_v9  ;;  %v1269_v9 = vld [vmem:[%s2866_s1 + $0x130] sm:$0xff]  ;;  %v1362_v56 = vld [vmem:[%s2866_s1 + $0x3a8] sm:$0xff] }
  0x56   : >> { %2040 = vmatpush3.bf16.msra.mxu0 %v2037_v57  ;;  %1978 = vmatprep.subr.bf16.mxu1 %v1977_v62  ;;  %v2049_v16 = vpack.c.bf16 %v1270_v14, %v1269_v9  ;;  %v2720_v57 = vmul.f32 %v794_v52, %v790_v51  ;;  %v2109_v60 = vpack.c.bf16 %v1362_v56, %v1361_v55  ;;  %v1367_v14 = vld [vmem:[%s2866_s1 + $0x3d0] sm:$0xff]  ;;  %v1388_v56 = vld [vmem:[%s2866_s1 + $0x478] sm:$0xff] }
  0x57   : >> { %2042 = vmatprep.subr.bf16.mxu0 %v2041_v63  ;;  %1699 = vmatprep.mubr.f32.mxu1 %v2436_v50  ;;  %v2153_v51 = vpack.c.bf16 %v1384_v49, %v1383_v48  ;;  %v1387_v55 = vld [vmem:[%s2866_s1 + $0x470] sm:$0xff] }
  0x58   : >> { %1769 = vmatprep.mubr.f32.mxu0 %v2436_v50  ;;  %v1271_v50 = vld [vmem:[%s2866_s1 + $0x140] sm:$0xff] }
  0x59   : >> { %1980 = vmatpush3.bf16.msra.mxu1 %v1977_v62  ;;  %v2053_v21 = vpack.c.bf16 %v1272_v19, %v1271_v50  ;;  %v1363_v62 = vld [vmem:[%s2866_s1 + $0x3b0] sm:$0xff]  ;;  %v1369_v19 = vld [vmem:[%s2866_s1 + $0x3e0] sm:$0xff] }
  0x5a   : >> { %2044 = vmatpush3.bf16.msra.mxu0 %v2041_v63  ;;  %1982 = vmatprep.subr.bf16.mxu1 %v1981_v8  ;;  %v1364_v63 = vld [vmem:[%s2866_s1 + $0x3b8] sm:$0xff] }
  0x5b   : >> { %2046 = vmatprep.subr.bf16.mxu0 %v2045_v10  ;;  %v2113_v5 = vpack.c.bf16 %v1364_v63, %v1363_v62 }
  0x5d   : >> { %1984 = vmatpush3.bf16.msra.mxu1 %v1981_v8  ;;  %v1366_v8 = vld [vmem:[%s2866_s1 + $0x3c8] sm:$0xff] }
  0x5e   : >> { %2048 = vmatpush3.bf16.msra.mxu0 %v2045_v10  ;;  %1986 = vmatprep.subr.bf16.mxu1 %v1985_v15  ;;  %v1349_v10 = vld [vmem:[%s2866_s1 + $0x340] sm:$0xff]  ;;  %v2117_v13 = vpack.c.bf16 %v1366_v8, %v1365_v7 }
  0x5f   : >> { %2050 = vmatprep.subr.bf16.mxu0 %v2049_v16  ;;  %v2085_v9 = vpack.c.bf16 %v1350_v11, %v1349_v10 }
  0x61   : >> { %1988 = vmatpush3.bf16.msra.mxu1 %v1985_v15  ;;  %v1368_v15 = vld [vmem:[%s2866_s1 + $0x3d8] sm:$0xff] }
  0x62   : >> { %2052 = vmatpush3.bf16.msra.mxu0 %v2049_v16  ;;  %1990 = vmatprep.subr.bf16.mxu1 %v1989_v20  ;;  %v1351_v16 = vld [vmem:[%s2866_s1 + $0x350] sm:$0xff]  ;;  %v2121_v18 = vpack.c.bf16 %v1368_v15, %v1367_v14 }
  0x63   : >> { %2054 = vmatprep.subr.bf16.mxu0 %v2053_v21  ;;  %v2089_v50 = vpack.c.bf16 %v1352_v17, %v1351_v16 }
  0x65   : >> { %1992 = vmatpush3.bf16.msra.mxu1 %v1989_v20  ;;  %v1370_v20 = vld [vmem:[%s2866_s1 + $0x3e8] sm:$0xff] }
  0x66   : >> { %2056 = vmatpush3.bf16.msra.mxu0 %v2053_v21  ;;  %1994 = vmatprep.subr.bf16.mxu1 %v1993_v26  ;;  %v1353_v21 = vld [vmem:[%s2866_s1 + $0x360] sm:$0xff]  ;;  %v2125_v23 = vpack.c.bf16 %v1370_v20, %v1369_v19 }
  0x67   : >> { %2058 = vmatprep.subr.bf16.mxu0 %v2057_v27  ;;  %v2093_v24 = vpack.c.bf16 %v1354_v22, %v1353_v21 }
  0x69   : >> { %1996 = vmatpush3.bf16.msra.mxu1 %v1993_v26  ;;  %v1372_v26 = vld [vmem:[%s2866_s1 + $0x3f8] sm:$0xff] }
  0x6a   : >> { %2060 = vmatpush3.bf16.msra.mxu0 %v2057_v27  ;;  %1998 = vmatprep.subr.bf16.mxu1 %v1997_v32  ;;  %v1355_v27 = vld [vmem:[%s2866_s1 + $0x370] sm:$0xff]  ;;  %v2129_v29 = vpack.c.bf16 %v1372_v26, %v1371_v25 }
  0x6b   : >> { %2062 = vmatprep.subr.bf16.mxu0 %v2061_v33  ;;  %v2097_v30 = vpack.c.bf16 %v1356_v28, %v1355_v27 }
  0x6d   : >> { %2000 = vmatpush3.bf16.msra.mxu1 %v1997_v32  ;;  %v1374_v32 = vld [vmem:[%s2866_s1 + $0x408] sm:$0xff] }
  0x6e   : >> { %2064 = vmatpush3.bf16.msra.mxu0 %v2061_v33  ;;  %2002 = vmatprep.subr.bf16.mxu1 %v2001_v38  ;;  %v791_v33 = vld [vmem:[%s2696_s19 + $0x8] sm:$0xff]  ;;  %v2133_v34 = vpack.c.bf16 %v1374_v32, %v1373_v31 }
  0x6f   : >> { %2066 = vmatprep.subr.bf16.mxu0 %v2065_v39  ;;  %v796_v35 = vmul.f32 %v794_v52, %v791_v33  ;;  %v1385_v52 = vld [vmem:[%s2866_s1 + $0x460] sm:$0xff] }
  0x71   : >> { %2004 = vmatpush3.bf16.msra.mxu1 %v2001_v38  ;;  %v2137_v38 = vpack.c.bf16 %v1376_v37, %v1375_v36 }
  0x72   : >> { %2068 = vmatpush3.bf16.msra.mxu0 %v2065_v39  ;;  %2102 = vmatprep.subr.bf16.mxu1 %v2101_v44  ;;  %v1377_v39 = vld [vmem:[%s2866_s1 + $0x420] sm:$0xff] }
  0x73   : >> { %2070 = vmatprep.subr.bf16.mxu0 %v2069_v45  ;;  %v2141_v41 = vpack.c.bf16 %v1378_v40, %v1377_v39 }
  0x74   : >> { %1700 = vmatmul.mubr.f32.vlgmr.msra.gmra.mrb[2].mxu1 %v2481_v12 }
  0x75   : >> { %1770 = vmatmul.mubr.f32.vlgmr.msra.gmra.mrb[2].mxu0 %v2481_v12  ;;  %2104 = vmatpush3.bf16.msra.mxu1 %v2101_v44  ;;  %v1347_v12 = vld [vmem:[%s2866_s1 + $0x330] sm:$0xff]  ;;  %v2145_v44 = vpack.c.bf16 %v1380_v43, %v1379_v42 }
  0x76   : >> { %2072 = vmatpush3.bf16.msra.mxu0 %v2069_v45  ;;  %2106 = vmatprep.subr.bf16.mxu1 %v2105_v53  ;;  %v2081_v6 = vpack.c.bf16 %v1348_v0, %v1347_v12  ;;  %v1381_v45 = vld [vmem:[%s2866_s1 + $0x440] sm:$0xff] }
  0x77   : >> { %2074 = vmatprep.subr.bf16.mxu0 %v2073_v54  ;;  %1804 = vmatprep.mubr.f32.mxu0 %v2720_v57  ;;  %v2149_v47 = vpack.c.bf16 %v1382_v46, %v1381_v45 }
  0x78   : >> { %1839 = vmatprep.mubr.f32.mxu1 %v2720_v57 }
  0x79   : >> { %2108 = vmatpush3.bf16.msra.mxu1 %v2105_v53  ;;  %v1386_v53 = vld [vmem:[%s2866_s1 + $0x468] sm:$0xff] }
  0x7a   : >> { %2076 = vmatpush3.bf16.msra.mxu0 %v2073_v54  ;;  %2110 = vmatprep.subr.bf16.mxu1 %v2109_v60  ;;  %v2157_v54 = vpack.c.bf16 %v1386_v53, %v1385_v52 }
  0x7b   : >> { %2078 = vmatprep.subr.bf16.mxu0 %v2077_v61 }
  0x7d   : >> { %2112 = vmatpush3.bf16.msra.mxu1 %v2109_v60 }
  0x7e   : >> { %2080 = vmatpush3.bf16.msra.mxu0 %v2077_v61  ;;  %2114 = vmatprep.subr.bf16.mxu1 %v2113_v5 }
  0x7f   : >> { %2082 = vmatprep.subr.bf16.mxu0 %v2081_v6 }
  0x81   : >> { %2116 = vmatpush3.bf16.msra.mxu1 %v2113_v5 }
  0x82   : >> { %2084 = vmatpush3.bf16.msra.mxu0 %v2081_v6  ;;  %2118 = vmatprep.subr.bf16.mxu1 %v2117_v13 }
  0x83   : >> { %2086 = vmatprep.subr.bf16.mxu0 %v2085_v9 }
  0x85   : >> { %2120 = vmatpush3.bf16.msra.mxu1 %v2117_v13 }
  0x86   : >> { %2088 = vmatpush3.bf16.msra.mxu0 %v2085_v9  ;;  %2122 = vmatprep.subr.bf16.mxu1 %v2121_v18 }
  0x87   : >> { %2090 = vmatprep.subr.bf16.mxu0 %v2089_v50 }
  0x89   : >> { %2124 = vmatpush3.bf16.msra.mxu1 %v2121_v18 }
  0x8a   : >> { %2092 = vmatpush3.bf16.msra.mxu0 %v2089_v50  ;;  %2126 = vmatprep.subr.bf16.mxu1 %v2125_v23 }
  0x8b   : >> { %2094 = vmatprep.subr.bf16.mxu0 %v2093_v24 }
  0x8d   : >> { %2128 = vmatpush3.bf16.msra.mxu1 %v2125_v23 }
  0x8e   : >> { %2096 = vmatpush3.bf16.msra.mxu0 %v2093_v24  ;;  %2130 = vmatprep.subr.bf16.mxu1 %v2129_v29 }
  0x8f   : >> { %2098 = vmatprep.subr.bf16.mxu0 %v2097_v30 }
  0x91   : >> { %2132 = vmatpush3.bf16.msra.mxu1 %v2129_v29 }
  0x92   : >> { %2100 = vmatpush3.bf16.msra.mxu0 %v2097_v30 }
  0x93   : >> { %2134 = vmatprep.subr.bf16.mxu0 %v2133_v34 }
  0x94   : >> { %1840 = vmatmul.mubr.f32.vlgmr.msra.gmra.mrb[2].mxu1 %v796_v35 }
  0x95   : >> { %1805 = vmatmul.mubr.f32.vlgmr.msra.gmra.mrb[0].mxu0 %v796_v35 }
  0x96   : >> { %2136 = vmatpush3.bf16.msra.mxu0 %v2133_v34  ;;  %1874 = vmatprep.mubr.f32.mxu0 %v2720_v57  ;;  %v2161_v57 = vpack.c.bf16 %v1388_v56, %v1387_v55 }
  0x97   : >> { %2138 = vmatprep.subr.bf16.mxu0 %v2137_v38 }
  0x9a   : >> { %2140 = vmatpush3.bf16.msra.mxu0 %v2137_v38 }
  0x9b   : >> { %2142 = vmatprep.subr.bf16.mxu0 %v2141_v41 }
  0x9e   : >> { %2144 = vmatpush3.bf16.msra.mxu0 %v2141_v41 }
  0x9f   : >> { %2146 = vmatprep.subr.bf16.mxu0 %v2145_v44 }
  0xa2   : >> { %2148 = vmatpush3.bf16.msra.mxu0 %v2145_v44 }
  0xa3   : >> { %2150 = vmatprep.subr.bf16.mxu0 %v2149_v47 }
  0xa6   : >> { %2152 = vmatpush3.bf16.msra.mxu0 %v2149_v47 }
  0xa7   : >> { %2154 = vmatprep.subr.bf16.mxu0 %v2153_v51 }
  0xaa   : >> { %2156 = vmatpush3.bf16.msra.mxu0 %v2153_v51 }
  0xab   : >> { %2158 = vmatprep.subr.bf16.mxu0 %v2157_v54 }
  0xae   : >> { %2160 = vmatpush3.bf16.msra.mxu0 %v2157_v54 }
  0xaf   : >> { %2162 = vmatprep.subr.bf16.mxu0 %v2161_v57 }
  0xb2   : >> { %2164 = vmatpush3.bf16.msra.mxu0 %v2161_v57 }
  0xb5   : >> { %1875 = vmatmul.mubr.f32.vlgmr.msra.gmra.mrb[2].mxu0 %v796_v35 }
 0x107   : >> { %v1596_v58 = vpop.f32.mrb[0].mxu1 }
 0x108   : >> { %v361_v59 = vpop.f32.mrb[1].mxu1 }
 0x167   : >> { %v1841_v60 = vpop.f32.mrb[2].mxu1 }
 0x168   : >> { %v1806_v61 = vpop.f32.mrb[0].mxu0  ;;  %v974_v62 = vpop.f32.mrb[3].mxu1 }
 0x169   : >> { %v2165_v63 = vadd.f32 %v1806_v61, %v1596_v58  ;;  %v880_v12 = vpop.f32.mrb[1].mxu0 }
 0x16a   : >> { %v2166_v0 = vadd.f32 %v880_v12, %v361_v59 }
 0x16b   : >> { %v1082_v5 = vrot.slane %v2165_v63, 7 }
 0x16c   : >> { %v1081_v6 = vrot.slane %v2166_v0, 7 }
 0x16e   : >> { %v1084_v7 = vsel %vm1083_vm0, %v1081_v6, %v1082_v5  ;;  %v1085_v8 = vsel %vm1083_vm0, %v1082_v5, %v1081_v6 }
 0x16f   : >> { %v1086_v10 = vsel %vm1079_vm1, %v1085_v8, 0.0  ;;  %v1098_v11 = vadd.f32 %v1841_v60, %v1084_v7 }
 0x170   : >> { %v1097_v13 = vadd.f32 %v1086_v10, %v974_v62 }
 0x188   : >> { %v1876_v9 = vpop.f32.mrb[2].mxu0 }
 0x189   : >> { %v1091_v14 = vrot.slane %v1876_v9, 1  ;;  %v1068_v15 = vpop.f32.mrb[3].mxu0 }
 0x18a   : >> { %v1090_v16 = vrot.slane %v1068_v15, 1 }
 0x18c   : >> { %v1093_v17 = vsel %vm1092_vm2, %v1090_v16, %v1091_v14  ;;  %v1094_v18 = vsel %vm1092_vm2, %v1091_v14, %v1090_v16 }
 0x18d   : >> { %v1096_v50 = vsel %vm1089_vm3, %v1094_v18, 0.0  ;;  %v1099_v19 = vadd.f32 %v1097_v13, %v1093_v17 }
 0x18e   : >> { %v1100_v20 = vadd.f32 %v1098_v11, %v1096_v50 }
 0x18f   : >> { %1103 = vst [vmem:[%s1102_s13] sm:$0xff] %v1099_v19  ;;  %v1113_v21 = vmul.f32 %v1099_v19, %v1099_v19 }
 0x190   : >> { %1104 = vst [vmem:[%s1102_s13 + $0x8] sm:$0xff] %v1100_v20  ;;  %v1105_v22 = vadd.f32 %v1100_v20, %v1099_v19  ;;  %v1114_v23 = vmul.f32 %v1100_v20, %v1100_v20 }
 0x192   : >> { %v1106_v24 = vrot.slane %v1105_v22, 4  ;;  %v1115_v25 = vadd.f32 %v1114_v23, %v1113_v21 }
 0x194   : >> { %v1107_v26 = vadd.f32 %v1106_v24, %v1105_v22  ;;  %v1116_v27 = vrot.slane %v1115_v25, 4 }
 0x196   : >> { %v1108_v28 = vrot.slane %v1107_v26, 2  ;;  %v1117_v29 = vadd.f32 %v1116_v27, %v1115_v25 }
 0x198   : >> { %v1109_v30 = vadd.f32 %v1108_v28, %v1107_v26  ;;  %v1118_v31 = vrot.slane %v1117_v29, 2 }
 0x19a   : >> { %v1110_v32 = vrot.slane %v1109_v30, 1  ;;  %v1119_v33 = vadd.f32 %v1118_v31, %v1117_v29 }
 0x19c   : >> { %v1111_v34 = vadd.f32 %v1110_v32, %v1109_v30  ;;  %v1120_v35 = vrot.slane %v1119_v33, 1  ;;  %189 = sbr.rel (!%p187_p5) target bundleno = 17 (0x11), region = 89 }
 0x19e   : >> { %v1112_v36 = vadd.f32 %v2235_v4, %v1111_v34   ;;  %v1121_v37 = vadd.f32 %v1120_v35, %v1119_v33 }
 0x1a0   : >> { %v1122_v38 = vadd.f32 %v2231_v3, %v1121_v37   ;;  %v2873_v4 = vmov %v1112_v36  ;;  %1123 = vst [vmem:[%s2287_s24] sm:$0x1] (%p187_p5), %v1112_v36 }
 0x1a2   : >> { %v2872_v3 = vmov %v1122_v38  ;;  %1124 = vst [vmem:[%s2287_s24 + $0x1] sm:$0x1] (%p187_p5), %v1122_v38 }
 0x1a3 PF: > { %s14_s12 = sadd.s32 1, %s2227_s12  }
 0x1a4   : > { %p11_p6 = scmp.ge.s32.totalorder %s14_s12, 4  }
 0x1a6   :  { %13 = sbr.rel (!%p11_p6) target bundleno = 1 (0x1), region = 100 }

</bundles_post_ra>
